<compile_context>
chip_gen: v7x
topology: tpu7x:2x2x1
jax: 0.10.0
libtpu: 0.0.40
codegen_flags: <defaults>
</compile_context>

<pallas_src>
import jax
import jax.numpy as jnp
from jax.experimental import pallas as pl
from jax.experimental.pallas import tpu as pltpu

LANE = 128      # lane width
SUBLANE = 16    # bf16 sublane packing


def _round_up(x, m):
    return (x + m - 1) // m * m


def _mlp_kernel(x_ref,
                w1t_ref, b1_ref,
                w2t_ref, b2_ref,
                w3t_ref, b3_ref,
                w4_ref, b4_ref,
                o_ref):
    """Fused 4-layer MLP, batch on sublanes: h = x @ W^T (+ bias, LeakyReLU(0.1))."""

    def leaky_relu(h):
        return jnp.where(h > 0, h, jnp.float32(0.1) * h)

    x = x_ref[...].astype(jnp.bfloat16)                        # (tile_b, Fp)

    h = jnp.dot(x, w1t_ref[...], preferred_element_type=jnp.float32)
    h = leaky_relu(h + b1_ref[...]).astype(jnp.bfloat16)       # dropout1: identity (eval)

    h = jnp.dot(h, w2t_ref[...], preferred_element_type=jnp.float32)
    h = leaky_relu(h + b2_ref[...]).astype(jnp.bfloat16)       # dropout2: identity (eval)

    h = jnp.dot(h, w3t_ref[...], preferred_element_type=jnp.float32)
    h = leaky_relu(h + b3_ref[...])                            # dropout3: identity (eval); keep f32

    # Layer 4 (out_features = 1): VPU broadcast-multiply + lane reduce, f32.
    out = jnp.sum(h * w4_ref[...], axis=1, keepdims=True) + b4_ref[0, 0]
    o_ref[...] = out.astype(o_ref.dtype)                       # (tile_b, 1)


def pack_params(params):
    """One-time packing: transpose weights to (in, out), pad to 16-multiples, bf16 cast."""
    w1, b1 = params["w1"], params["b1"]
    w2, b2 = params["w2"], params["b2"]
    w3, b3 = params["w3"], params["b3"]
    w4, b4 = params["w4"], params["b4"]

    H1, F = w1.shape
    H2, H3 = w2.shape[0], w3.shape[0]
    Fp = _round_up(F, SUBLANE)
    H1p = _round_up(H1, SUBLANE)
    H2p = _round_up(H2, SUBLANE)
    H3p = _round_up(H3, SUBLANE)

    def pad_t(w, rows, cols):                  # (out, in) -> padded (in, out) bf16
        wt = w.T
        wt = jnp.pad(wt, ((0, rows - wt.shape[0]), (0, cols - wt.shape[1])))
        return wt.astype(jnp.bfloat16)

    def pad_b(b, cols):                        # (out,) -> (1, out_p) f32 row
        return jnp.pad(b.reshape(1, -1), ((0, 0), (0, cols - b.shape[0]))).astype(jnp.float32)

    packed = {
        "F": F, "Fp": Fp,
        "w1t": pad_t(w1, Fp, H1p),  "b1": pad_b(b1, H1p),
        "w2t": pad_t(w2, H1p, H2p), "b2": pad_b(b2, H2p),
        "w3t": pad_t(w3, H2p, H3p), "b3": pad_b(b3, H3p),
        # w4 kept f32 (1, H3p) row for the VPU multiply+reduce in the last layer.
        "w4": jnp.pad(w4.reshape(1, -1), ((0, 0), (0, H3p - H3))).astype(jnp.float32),
        "b4": b4.reshape(1, 1).astype(jnp.float32),            # scalar -> SMEM
    }
    return packed


def house_prices_nn_forward(x, packed, *, tile_b=2048):
    """Run the fused MLP kernel.

    x:      (B, input_size) float32, batch-major (PyTorch convention).
    packed: output of pack_params().
    Returns (B, 1) float32.
    """
    B, F = x.shape
    assert F == packed["F"], "feature size mismatch with packed params"
    Fp = packed["Fp"]
    H1p = packed["w1t"].shape[1]
    H2p = packed["w2t"].shape[1]
    H3p = packed["w3t"].shape[1]

    # Batch tile: multiple of 128 (lane-friendly sublane count), capped by batch.
    tile_b = max(LANE, _round_up(tile_b, LANE))
    tile_b = min(tile_b, _round_up(B, LANE))
    Bp = _round_up(B, tile_b)
    grid = (Bp // tile_b,)

    # Only per-call prep: pad batch (and feature, if not a 16-multiple) with zeros.
    if (Bp != B) or (Fp != F):
        x = jnp.pad(x, ((0, Bp - B), (0, Fp - F)))

    const = lambda shape: pl.BlockSpec(shape, lambda i: (0, 0))   # resident weights/biases

    out = pl.pallas_call(
        _mlp_kernel,
        out_shape=jax.ShapeDtypeStruct((Bp, 1), jnp.float32),
        grid_spec=pltpu.PrefetchScalarGridSpec(
            num_scalar_prefetch=0,
            grid=grid,
            in_specs=[
                pl.BlockSpec((tile_b, Fp), lambda i: (i, 0)),     # streamed x tile (f32)
                const((Fp, H1p)), const((1, H1p)),
                const((H1p, H2p)), const((1, H2p)),
                const((H2p, H3p)), const((1, H3p)),
                const((1, H3p)),
                pl.BlockSpec(memory_space=pltpu.MemorySpace.SMEM),  # b4 scalar
            ],
            out_specs=pl.BlockSpec((tile_b, 1), lambda i: (i, 0)),
        ),
        compiler_params=pltpu.CompilerParams(
            dimension_semantics=("parallel",)),
    )(x,
      packed["w1t"], packed["b1"],
      packed["w2t"], packed["b2"],
      packed["w3t"], packed["b3"],
      packed["w4"], packed["b4"])

    return out[:B, :]                                            # (B, 1)


def _kaiming_uniform(key, fan_out, fan_in, a=0.1):
    """kaiming_uniform_-style init; weight shape (out_features, in_features)."""
    gain = jnp.sqrt(2.0 / (1.0 + a * a))
    bound = gain * jnp.sqrt(3.0 / fan_in)
    return jax.random.uniform(key, (fan_out, fan_in), dtype=jnp.float32,
                              minval=-bound, maxval=bound)


def init_params(key, input_size, h1, h2, h3):
    k1, k2, k3, k4 = jax.random.split(key, 4)
    return {
        "w1": _kaiming_uniform(k1, h1, input_size),
        "b1": jnp.zeros((h1,), jnp.float32),
        "w2": _kaiming_uniform(k2, h2, h1),
        "b2": jnp.zeros((h2,), jnp.float32),
        "w3": _kaiming_uniform(k3, h3, h2),
        "b3": jnp.zeros((h3,), jnp.float32),
        "w4": _kaiming_uniform(k4, 1, h3),
        "b4": jnp.zeros((1,), jnp.float32),
    }


def _ref_forward(x, p, *, bf16_matmul=True):
    """Pure-JAX reference (dropout = identity, inference mode)."""
    lrelu = lambda h: jnp.where(h > 0, h, 0.1 * h)

    def dense(a, w, b):
        if bf16_matmul:
            a = a.astype(jnp.bfloat16)
            w = w.astype(jnp.bfloat16)
        return jnp.dot(a, w.T, preferred_element_type=jnp.float32) + b

    h = lrelu(dense(x, p["w1"], p["b1"]))
    h = lrelu(dense(h, p["w2"], p["b2"]))
    h = lrelu(dense(h, p["w3"], p["b3"]))
    # Layer 4 is computed in f32 in the kernel (VPU multiply + reduce).
    return jnp.dot(h.astype(jnp.float32), p["w4"].T) + p["b4"]


if __name__ == "__main__":
    key = jax.random.PRNGKey(0)
    k_x, k_p = jax.random.split(key)

    # Small shapes consistent with the module; batch=384 with tile_b=256 gives a
    # 2-step "parallel" grid and exercises the batch-padding path.
    batch = 384
    input_size, hidden1, hidden2, hidden3 = 32, 64, 32, 16

    x = jax.random.normal(k_x, (batch, input_size), dtype=jnp.float32)
    params = init_params(k_p, input_size, hidden1, hidden2, hidden3)

    packed = pack_params(params)                     # one-time weight packing
    packed = jax.tree_util.tree_map(
        lambda a: jax.block_until_ready(a) if isinstance(a, jax.Array) else a, packed)

    out = house_prices_nn_forward(x, packed, tile_b=256)
    out = jax.block_until_ready(out)
    assert out.shape == (batch, 1)

    # Tight check vs a reference using the same bf16-in / f32-accumulate matmuls.
    ref_bf16 = _ref_forward(x, params, bf16_matmul=True)
    assert jnp.allclose(out, ref_bf16, atol=2e-3, rtol=2e-3), "mismatch vs bf16 reference"

    # Loose sanity check vs the full-f32 reference (bounds bf16 rounding error).
    ref_f32 = _ref_forward(x, params, bf16_matmul=False)
    assert jnp.allclose(out, ref_f32, atol=1e-1, rtol=1e-1), "mismatch vs f32 reference"

    print("KERNEL_OK")
</pallas_src>

<mosaic_0001>
module attributes {stable_mosaic.version = 11 : i64} {
  func.func @_mlp_kernel(%arg0: i32, %arg1: memref<256x32xf32, #tpu.memory_space<vmem>>, %arg2: memref<32x64xbf16, #tpu.memory_space<vmem>>, %arg3: memref<1x64xf32, #tpu.memory_space<vmem>>, %arg4: memref<64x32xbf16, #tpu.memory_space<vmem>>, %arg5: memref<1x32xf32, #tpu.memory_space<vmem>>, %arg6: memref<32x16xbf16, #tpu.memory_space<vmem>>, %arg7: memref<1x16xf32, #tpu.memory_space<vmem>>, %arg8: memref<1x16xf32, #tpu.memory_space<vmem>>, %arg9: memref<1x1xf32, #tpu.memory_space<smem>>, %arg10: memref<256x1xf32, #tpu.memory_space<vmem>>) attributes {dimension_semantics = [#tpu.dimension_semantics<parallel>], iteration_bounds = array<i64: 2>, scalar_prefetch = 0 : i64, scratch_operands = 0 : i64, tpu.core_type = #tpu.core_type<tc>, window_params = [{transform_indices = @transform_0, window_bounds = array<i64: 256, 32>}, {pipeline_mode = #tpu.pipeline_mode<synchronous>, transform_indices = @transform_1, window_bounds = array<i64: 32, 64>}, {pipeline_mode = #tpu.pipeline_mode<synchronous>, transform_indices = @transform_2, window_bounds = array<i64: 1, 64>}, {pipeline_mode = #tpu.pipeline_mode<synchronous>, transform_indices = @transform_3, window_bounds = array<i64: 64, 32>}, {pipeline_mode = #tpu.pipeline_mode<synchronous>, transform_indices = @transform_4, window_bounds = array<i64: 1, 32>}, {pipeline_mode = #tpu.pipeline_mode<synchronous>, transform_indices = @transform_5, window_bounds = array<i64: 32, 16>}, {pipeline_mode = #tpu.pipeline_mode<synchronous>, transform_indices = @transform_6, window_bounds = array<i64: 1, 16>}, {pipeline_mode = #tpu.pipeline_mode<synchronous>, transform_indices = @transform_7, window_bounds = array<i64: 1, 16>}, {transform_indices = @transform_8, window_bounds = array<i64: 1, 1>}, {transform_indices = @transform_9, window_bounds = array<i64: 256, 1>}]} {
    %c0 = arith.constant 0 : index
    %c0_0 = arith.constant 0 : index
    %0 = vector.load %arg1[%c0, %c0_0] : memref<256x32xf32, #tpu.memory_space<vmem>>, vector<256x32xf32>
    %1 = arith.truncf %0 : vector<256x32xf32> to vector<256x32xbf16>
    %c0_1 = arith.constant 0 : index
    %c0_2 = arith.constant 0 : index
    %2 = vector.load %arg2[%c0_1, %c0_2] : memref<32x64xbf16, #tpu.memory_space<vmem>>, vector<32x64xbf16>
    %cst = arith.constant dense<0.000000e+00> : vector<256x64xf32>
    %3 = tpu.matmul %1, %2, %cst {dimension_numbers = #tpu.dot_dimension_numbers<[1], [0], [0], [1], [0, 0, 1, 1], [], []>} : vector<256x32xbf16>, vector<32x64xbf16>, vector<256x64xf32> -> vector<256x64xf32>
    %c0_3 = arith.constant 0 : index
    %c0_4 = arith.constant 0 : index
    %4 = vector.load %arg3[%c0_3, %c0_4] : memref<1x64xf32, #tpu.memory_space<vmem>>, vector<1x64xf32>
    %5 = vector.broadcast %4 : vector<1x64xf32> to vector<256x64xf32>
    %6 = arith.addf %3, %5 : vector<256x64xf32>
    %cst_5 = arith.constant 0.000000e+00 : f32
    %7 = vector.broadcast %cst_5 : f32 to vector<256x64xf32>
    %8 = arith.cmpf ogt, %6, %7 : vector<256x64xf32>
    %cst_6 = arith.constant 1.000000e-01 : f32
    %9 = vector.broadcast %cst_6 : f32 to vector<256x64xf32>
    %10 = arith.mulf %9, %6 : vector<256x64xf32>
    %11 = arith.select %8, %6, %10 : vector<256x64xi1>, vector<256x64xf32>
    %12 = arith.truncf %11 : vector<256x64xf32> to vector<256x64xbf16>
    %c0_7 = arith.constant 0 : index
    %c0_8 = arith.constant 0 : index
    %13 = vector.load %arg4[%c0_7, %c0_8] : memref<64x32xbf16, #tpu.memory_space<vmem>>, vector<64x32xbf16>
    %cst_9 = arith.constant dense<0.000000e+00> : vector<256x32xf32>
    %14 = tpu.matmul %12, %13, %cst_9 {dimension_numbers = #tpu.dot_dimension_numbers<[1], [0], [0], [1], [0, 0, 1, 1], [], []>} : vector<256x64xbf16>, vector<64x32xbf16>, vector<256x32xf32> -> vector<256x32xf32>
    %c0_10 = arith.constant 0 : index
    %c0_11 = arith.constant 0 : index
    %15 = vector.load %arg5[%c0_10, %c0_11] : memref<1x32xf32, #tpu.memory_space<vmem>>, vector<1x32xf32>
    %16 = vector.broadcast %15 : vector<1x32xf32> to vector<256x32xf32>
    %17 = arith.addf %14, %16 : vector<256x32xf32>
    %cst_12 = arith.constant 0.000000e+00 : f32
    %18 = vector.broadcast %cst_12 : f32 to vector<256x32xf32>
    %19 = arith.cmpf ogt, %17, %18 : vector<256x32xf32>
    %cst_13 = arith.constant 1.000000e-01 : f32
    %20 = vector.broadcast %cst_13 : f32 to vector<256x32xf32>
    %21 = arith.mulf %20, %17 : vector<256x32xf32>
    %22 = arith.select %19, %17, %21 : vector<256x32xi1>, vector<256x32xf32>
    %23 = arith.truncf %22 : vector<256x32xf32> to vector<256x32xbf16>
    %c0_14 = arith.constant 0 : index
    %c0_15 = arith.constant 0 : index
    %24 = vector.load %arg6[%c0_14, %c0_15] : memref<32x16xbf16, #tpu.memory_space<vmem>>, vector<32x16xbf16>
    %cst_16 = arith.constant dense<0.000000e+00> : vector<256x16xf32>
    %25 = tpu.matmul %23, %24, %cst_16 {dimension_numbers = #tpu.dot_dimension_numbers<[1], [0], [0], [1], [0, 0, 1, 1], [], []>} : vector<256x32xbf16>, vector<32x16xbf16>, vector<256x16xf32> -> vector<256x16xf32>
    %c0_17 = arith.constant 0 : index
    %c0_18 = arith.constant 0 : index
    %26 = vector.load %arg7[%c0_17, %c0_18] : memref<1x16xf32, #tpu.memory_space<vmem>>, vector<1x16xf32>
    %27 = vector.broadcast %26 : vector<1x16xf32> to vector<256x16xf32>
    %28 = arith.addf %25, %27 : vector<256x16xf32>
    %cst_19 = arith.constant 0.000000e+00 : f32
    %29 = vector.broadcast %cst_19 : f32 to vector<256x16xf32>
    %30 = arith.cmpf ogt, %28, %29 : vector<256x16xf32>
    %cst_20 = arith.constant 1.000000e-01 : f32
    %31 = vector.broadcast %cst_20 : f32 to vector<256x16xf32>
    %32 = arith.mulf %31, %28 : vector<256x16xf32>
    %33 = arith.select %30, %28, %32 : vector<256x16xi1>, vector<256x16xf32>
    %c0_21 = arith.constant 0 : index
    %c0_22 = arith.constant 0 : index
    %34 = vector.load %arg8[%c0_21, %c0_22] : memref<1x16xf32, #tpu.memory_space<vmem>>, vector<1x16xf32>
    %35 = vector.broadcast %34 : vector<1x16xf32> to vector<256x16xf32>
    %36 = arith.mulf %33, %35 : vector<256x16xf32>
    %cst_23 = arith.constant dense<0.000000e+00> : vector<256xf32>
    %37 = vector.multi_reduction <add>, %36, %cst_23 [1] : vector<256x16xf32> to vector<256xf32>
    %38 = vector.shape_cast %37 : vector<256xf32> to vector<256x1xf32>
    %c0_24 = arith.constant 0 : index
    %c0_25 = arith.constant 0 : index
    %39 = memref.load %arg9[%c0_24, %c0_25] : memref<1x1xf32, #tpu.memory_space<smem>>
    %40 = vector.broadcast %39 : f32 to vector<256x1xf32>
    %41 = arith.addf %38, %40 : vector<256x1xf32>
    %c0_26 = arith.constant 0 : index
    %c0_27 = arith.constant 0 : index
    %42 = vector.load %arg10[%c0_26, %c0_27] : memref<256x1xf32, #tpu.memory_space<vmem>>, vector<256x1xf32>
    tpu.vector_store %arg10[%c0_26, %c0_27], %41 {strides = array<i32>} : memref<256x1xf32, #tpu.memory_space<vmem>>, vector<256x1xf32>,
    return
  }
  func.func @transform_0(%arg0: i32) -> (i32, i32) {
    %c0_i32 = arith.constant 0 : i32
    %c0_i32_0 = arith.constant 0 : i32
    return %arg0, %c0_i32 : i32, i32
  }
  func.func @transform_1(%arg0: i32) -> (i32, i32) {
    %c0_i32 = arith.constant 0 : i32
    %c0_i32_0 = arith.constant 0 : i32
    %c0_i32_1 = arith.constant 0 : i32
    return %c0_i32, %c0_i32_0 : i32, i32
  }
  func.func @transform_2(%arg0: i32) -> (i32, i32) {
    %c0_i32 = arith.constant 0 : i32
    %c0_i32_0 = arith.constant 0 : i32
    %c0_i32_1 = arith.constant 0 : i32
    return %c0_i32, %c0_i32_0 : i32, i32
  }
  func.func @transform_3(%arg0: i32) -> (i32, i32) {
    %c0_i32 = arith.constant 0 : i32
    %c0_i32_0 = arith.constant 0 : i32
    %c0_i32_1 = arith.constant 0 : i32
    return %c0_i32, %c0_i32_0 : i32, i32
  }
  func.func @transform_4(%arg0: i32) -> (i32, i32) {
    %c0_i32 = arith.constant 0 : i32
    %c0_i32_0 = arith.constant 0 : i32
    %c0_i32_1 = arith.constant 0 : i32
    return %c0_i32, %c0_i32_0 : i32, i32
  }
  func.func @transform_5(%arg0: i32) -> (i32, i32) {
    %c0_i32 = arith.constant 0 : i32
    %c0_i32_0 = arith.constant 0 : i32
    %c0_i32_1 = arith.constant 0 : i32
    return %c0_i32, %c0_i32_0 : i32, i32
  }
  func.func @transform_6(%arg0: i32) -> (i32, i32) {
    %c0_i32 = arith.constant 0 : i32
    %c0_i32_0 = arith.constant 0 : i32
    %c0_i32_1 = arith.constant 0 : i32
    return %c0_i32, %c0_i32_0 : i32, i32
  }
  func.func @transform_7(%arg0: i32) -> (i32, i32) {
    %c0_i32 = arith.constant 0 : i32
    %c0_i32_0 = arith.constant 0 : i32
    %c0_i32_1 = arith.constant 0 : i32
    return %c0_i32, %c0_i32_0 : i32, i32
  }
  func.func @transform_8(%arg0: i32) -> (i32, i32) {
    %c0_i32 = arith.constant 0 : i32
    %c0_i32_0 = arith.constant 0 : i32
    %c0_i32_1 = arith.constant 0 : i32
    return %c0_i32, %c0_i32_0 : i32, i32
  }
  func.func @transform_9(%arg0: i32) -> (i32, i32) {
    %c0_i32 = arith.constant 0 : i32
    %c0_i32_0 = arith.constant 0 : i32
    return %arg0, %c0_i32 : i32, i32
  }
}

</mosaic_0001>

<bundles_post_ra>
// kernel: tpu_custom_call.1
= control target key start
LH: loop header
LB: loop body
LE: loop exit
PB: predicated region body
PF: predicated region fallthrough
CT: control target
= control target key end

     0   :  { %s1999_s11 = smov 0   ;;  %s2441_s0 = inlined_call_operand.vmem [shape: f32[512,32], index: 0, kind: input, shape index: {}]   ;;  %s2442_s1 = inlined_call_operand.vmem [shape: bf16[32,64], index: 1, kind: input, shape index: {}]   ;;  %s2443_s2 = inlined_call_operand.vmem [shape: f32[1,64], index: 2, kind: input, shape index: {}]   ;;  %s2444_s3 = inlined_call_operand.vmem [shape: bf16[64,32], index: 3, kind: input, shape index: {}]   ;;  %s2445_s4 = inlined_call_operand.vmem [shape: f32[1,32], index: 4, kind: input, shape index: {}]   ;;  %s2446_s5 = inlined_call_operand.vmem [shape: bf16[32,16], index: 5, kind: input, shape index: {}]   ;;  %s2447_s6 = inlined_call_operand.vmem [shape: f32[1,16], index: 6, kind: input, shape index: {}]   ;;  %s2448_s7 = inlined_call_operand.vmem [shape: f32[1,16], index: 7, kind: input, shape index: {}]   ;;  %s2449_s8 = inlined_call_operand.<no memory space> [shape: f32[1,1], index: 8, kind: input, shape index: {}]   ;;  %s2450_s9 = inlined_call_operand.vmem [shape: f32[512,1], index: 9, kind: output, shape index: {}]  }
   0x1   :  { %14 = sst [smem:[#allocation2]] %s2449_s8 }
   0x2 LB: > { %s1679_s12 = sadd.s32 4294967295, %s1944_s11   ;;  %p1683_p0 = scmp.ge.s32.totalorder %s1944_s11, 1  ;;  %s1944_s11 = sphi %s1999_s11, %s20_s11  }
   0x3   : > { %p289_p1 = scmp.lt.s32.totalorder %s1944_s11, 3 }
   0x5   : > { %p290_p2 = pnand %p1683_p0, %p289_p1 }
   0x6   : > { %v1930_v0 = vld [vmem:[%s2442_s1] sm:$0xff] (!%p290_p2)   ;;  %s1684_s8 = sshll.u32 (!%p290_p2), %s1679_s12, 5  ;;  %v1931_v1 = vld [vmem:[%s2442_s1 + $0x8] sm:$0xff] (!%p290_p2)   ;;  %vm409_vm0 = vcmask (!%p290_p2), 261120   ;;  %v1934_v32 = vld [vmem:[%s2444_s3 + $0x10] sm:$0xff] (!%p290_p2)   ;;  %vm770_vm5 = vcmask (!%p290_p2), 523264  }
   0x7   : > { %293 = sbr.rel (%p290_p2) target bundleno = 895 (0x37f), region = 56  ;;  %p326_p3 = scmp.lt.s32.totalorder (!%p290_p2), %s1684_s8, 63  ;;  %1806 = vmatprep.subr.bf16.mxu0 (!%p290_p2), %v1930_v0  ;;  %1918 = vmatprep.subr.bf16.mxu1 (!%p290_p2), %v1930_v0  ;;  %v1932_v2 = vld [vmem:[%s2444_s3] sm:$0xff] (!%p290_p2)   ;;  %v1933_v24 = vld [vmem:[%s2444_s3 + $0x8] sm:$0xff] (!%p290_p2)   ;;  %v1935_v53 = vld [vmem:[%s2444_s3 + $0x18] sm:$0xff] (!%p290_p2)  }
   0x8   : > { %1807 = vmatpush3.bf16.msra.mxu0 (!%p290_p2), %v1930_v0  ;;  %1920 = vmatpush3.bf16.msra.mxu1 (!%p290_p2), %v1930_v0  ;;  %v1936_v54 = vld [vmem:[%s2446_s5] sm:$0xff] (!%p290_p2)   ;;  %v1937_v55 = vld [vmem:[%s2446_s5 + $0x8] sm:$0xff] (!%p290_p2)  }
   0x9   : > { %1808 = vmatprep.subr.bf16.mxu0 (!%p290_p2), %v1931_v1  ;;  %1919 = vmatprep.subr.bf16.mxu1 (!%p290_p2), %v1931_v1  ;;  %v2092_v56 = vld [vmem:[%s2443_s2] ss:$0 sm:$0xff] (!%p290_p2) }
   0xc   : > { %1809 = vmatpush3.bf16.msra.mxu0 (!%p290_p2), %v1931_v1  ;;  %1921 = vmatpush3.bf16.msra.mxu1 (!%p290_p2), %v1931_v1 }
   0xd   : > { %1842 = vmatprep.subr.bf16.mxu1 (!%p290_p2), %v1932_v2  ;;  %1882 = vmatprep.subr.bf16.mxu0 (!%p290_p2), %v1936_v54 }
   0xe   : > { %s2452_s8 = smov (!%p326_p3, %s1684_s8), 63 }
   0xf   : > { %s1685_s19 = sshll.u32 %s2452_s8, 3 }
  0x10   : > { %s2024_s22 = scalar_lea.vmem %s2441_s0, %s1685_s19  ;;  %s2340_s25 = scalar_lea.vmem %s2450_s9, %s1685_s19 }
  0x11   : > { %v338_v3 = vld [vmem:[%s2024_s22] sm:$0xff]  ;;  %v339_v4 = vld [vmem:[%s2024_s22 + $0x8] sm:$0xff]  ;;  %v340_v5 = vld [vmem:[%s2024_s22 + $0x10] sm:$0xff] }
  0x12   : > { %v370_v6 = vpack.c.bf16 %v339_v4, %v338_v3  ;;  %v341_v7 = vld [vmem:[%s2024_s22 + $0x18] sm:$0xff]  ;;  %v342_v8 = vld [vmem:[%s2024_s22 + $0x20] sm:$0xff]  ;;  %v343_v9 = vld [vmem:[%s2024_s22 + $0x28] sm:$0xff] }
  0x13   : > { %v371_v10 = vpack.c.bf16 %v341_v7, %v340_v5  ;;  %v372_v11 = vpack.c.bf16 %v343_v9, %v342_v8  ;;  %v344_v12 = vld [vmem:[%s2024_s22 + $0x30] sm:$0xff]  ;;  %v345_v13 = vld [vmem:[%s2024_s22 + $0x38] sm:$0xff]  ;;  %v346_v14 = vld [vmem:[%s2024_s22 + $0x40] sm:$0xff] }
  0x14   : > { %1810 = vmatprep.mubr.msk.bf16.mxu0 %vm409_vm0, %v370_v6  ;;  %v347_v15 = vld [vmem:[%s2024_s22 + $0x48] sm:$0xff]  ;;  %v354_v16 = vld [vmem:[%s2024_s22 + $0x80] sm:$0xff]  ;;  %v356_v19 = vld [vmem:[%s2024_s22 + $0x90] sm:$0xff]  ;;  %v373_v25 = vpack.c.bf16 %v345_v13, %v344_v12 }
  0x15   : > { %1811 = vmatmul.mubr.msk.bf16.vlgmr.msra.gmra.mrb[0].mxu0 %vm409_vm0, %v371_v10  ;;  %v355_v17 = vld [vmem:[%s2024_s22 + $0x88] sm:$0xff]  ;;  %v357_v20 = vld [vmem:[%s2024_s22 + $0x98] sm:$0xff]  ;;  %v358_v21 = vld [vmem:[%s2024_s22 + $0xa0] sm:$0xff]  ;;  %v374_v27 = vpack.c.bf16 %v347_v15, %v346_v14 }
  0x16   : > { %1814 = vmatprep.mubr.msk.bf16.mxu0 %vm409_vm0, %v372_v11  ;;  %v378_v18 = vpack.c.bf16 %v355_v17, %v354_v16  ;;  %v379_v22 = vpack.c.bf16 %v357_v20, %v356_v19  ;;  %v359_v23 = vld [vmem:[%s2024_s22 + $0xa8] sm:$0xff]  ;;  %v360_v28 = vld [vmem:[%s2024_s22 + $0xb0] sm:$0xff]  ;;  %v361_v29 = vld [vmem:[%s2024_s22 + $0xb8] sm:$0xff]  ;;  %1883 = vmatpush3.bf16.msra.mxu0 %v1936_v54 }
  0x17   : > { %v380_v26 = vpack.c.bf16 %v359_v23, %v358_v21  ;;  %v362_v30 = vld [vmem:[%s2024_s22 + $0xc0] sm:$0xff]  ;;  %v363_v31 = vld [vmem:[%s2024_s22 + $0xc8] sm:$0xff]  ;;  %v348_v33 = vld [vmem:[%s2024_s22 + $0x50] sm:$0xff]  ;;  %v381_v35 = vpack.c.bf16 %v361_v29, %v360_v28  ;;  %1884 = vmatprep.subr.bf16.mxu0 %v1937_v55 }
  0x18   : > { %1826 = vmatprep.mubr.msk.bf16.mxu1 %vm409_vm0, %v378_v18  ;;  %v349_v34 = vld [vmem:[%s2024_s22 + $0x58] sm:$0xff]  ;;  %v350_v36 = vld [vmem:[%s2024_s22 + $0x60] sm:$0xff]  ;;  %v351_v37 = vld [vmem:[%s2024_s22 + $0x68] sm:$0xff]  ;;  %v382_v38 = vpack.c.bf16 %v363_v31, %v362_v30 }
  0x19   : > { %1827 = vmatmul.mubr.msk.bf16.vlgmr.msra.gmra.mrb[0].mxu1 %vm409_vm0, %v379_v22  ;;  %v375_v39 = vpack.c.bf16 %v349_v34, %v348_v33  ;;  %v376_v40 = vpack.c.bf16 %v351_v37, %v350_v36  ;;  %v364_v41 = vld [vmem:[%s2024_s22 + $0xd0] sm:$0xff]  ;;  %v365_v42 = vld [vmem:[%s2024_s22 + $0xd8] sm:$0xff]  ;;  %v366_v43 = vld [vmem:[%s2024_s22 + $0xe0] sm:$0xff] }
  0x1a   : > { %1830 = vmatprep.mubr.msk.bf16.mxu1 %vm409_vm0, %v380_v26  ;;  %1843 = vmatpush3.bf16.msra.mxu1 %v1932_v2  ;;  %v367_v44 = vld [vmem:[%s2024_s22 + $0xe8] sm:$0xff]  ;;  %v352_v45 = vld [vmem:[%s2024_s22 + $0x70] sm:$0xff]  ;;  %v353_v46 = vld [vmem:[%s2024_s22 + $0x78] sm:$0xff]  ;;  %v383_v47 = vpack.c.bf16 %v365_v42, %v364_v41 }
  0x1b   : > { %1844 = vmatprep.subr.bf16.mxu1 %v1933_v24  ;;  %v384_v48 = vpack.c.bf16 %v367_v44, %v366_v43  ;;  %v377_v49 = vpack.c.bf16 %v353_v46, %v352_v45  ;;  %v368_v50 = vld [vmem:[%s2024_s22 + $0xf0] sm:$0xff]  ;;  %v369_v51 = vld [vmem:[%s2024_s22 + $0xf8] sm:$0xff]  ;;  %1885 = vmatpush3.bf16.msra.mxu0 %v1937_v55  ;;  %s1556_s22 = sld [smem:[#allocation2]] }
  0x1c   : > { %v385_v52 = vpack.c.bf16 %v369_v51, %v368_v50 }
  0x1d   : > { %1815 = vmatmul.mubr.msk.bf16.gmra.mrb[4].mxu0 %vm409_vm0, %v373_v25 }
  0x1e   : > { %1818 = vmatprep.mubr.msk.bf16.mxu0 %vm409_vm0, %v374_v27  ;;  %1845 = vmatpush3.bf16.msra.mxu1 %v1933_v24 }
  0x1f   : > { %1846 = vmatprep.subr.bf16.mxu1 %v1934_v32 }
  0x21   : > { %1831 = vmatmul.mubr.msk.bf16.gmra.mrb[4].mxu1 %vm409_vm0, %v381_v35 }
  0x22   : > { %1834 = vmatprep.mubr.msk.bf16.mxu1 %vm409_vm0, %v382_v38  ;;  %1847 = vmatpush3.bf16.msra.mxu1 %v1934_v32 }
  0x23   : > { %1848 = vmatprep.subr.bf16.mxu1 %v1935_v53 }
  0x25   : > { %1819 = vmatmul.mubr.msk.bf16.gmra.mrb[8].mxu0 %vm409_vm0, %v375_v39 }
  0x26   : > { %1822 = vmatprep.mubr.msk.bf16.mxu0 %vm409_vm0, %v376_v40  ;;  %1849 = vmatpush3.bf16.msra.mxu1 %v1935_v53 }
  0x29   : > { %1835 = vmatmul.mubr.msk.bf16.gmra.mrb[8].mxu1 %vm409_vm0, %v383_v47 }
  0x2a   : > { %1838 = vmatprep.mubr.msk.bf16.mxu1 %vm409_vm0, %v384_v48 }
  0x2d   : > { %1823 = vmatmul.mubr.msk.bf16.gmra.mrb[12].mxu0 %vm409_vm0, %v377_v49 }
  0x31   : > { %1839 = vmatmul.mubr.msk.bf16.gmra.mrb[12].mxu1 %vm409_vm0, %v385_v52 }
  0xe8   : > { %v1812_v57 = vpop.f32.mrb[0].mxu0 }
  0xe9   : > { %v501_v58 = vadd.f32 %v1812_v57, %v2092_v56  ;;  %v492_v59 = vpop.f32.mrb[1].mxu0 }
  0xea   : > { %v493_v60 = vadd.f32 %v2092_v56, %v492_v59  ;;  %v1813_v61 = vpop.f32.mrb[2].mxu0 }
  0xeb   : > { %v653_v62 = vmul.f32 0.1, %v501_v58  ;;  %v504_v63 = vadd.f32 %v1813_v61, %v2092_v56  ;;  %v495_v0 = vpop.f32.mrb[3].mxu0  ;;  %vm621_vm1 = vcmp.gt.f32.partialorder %v501_v58, 0.0 }
  0xec   : > { %vm619_vm2 = vcmp.gt.f32.partialorder %v493_v60, 0.0  ;;  %v651_v1 = vmul.f32 0.1, %v493_v60  ;;  %v496_v2 = vadd.f32 %v2092_v56, %v495_v0  ;;  %v1828_v4 = vpop.f32.mrb[0].mxu1 }
  0xed   : > { %vm622_vm3 = vcmp.gt.f32.partialorder %v504_v63, 0.0  ;;  %v654_v3 = vmul.f32 0.1, %v504_v63  ;;  %v565_v6 = vadd.f32 %v1828_v4, %v2092_v56  ;;  %v556_v7 = vpop.f32.mrb[1].mxu1  ;;  %v685_v8 = vsel %vm621_vm1, %v501_v58, %v653_v62 }
  0xee   : > { %vm620_vm4 = vcmp.gt.f32.partialorder %v496_v2, 0.0  ;;  %v652_v5 = vmul.f32 0.1, %v496_v2  ;;  %v683_v9 = vsel %vm619_vm2, %v493_v60, %v651_v1  ;;  %v557_v11 = vadd.f32 %v2092_v56, %v556_v7  ;;  %v1829_v12 = vpop.f32.mrb[2].mxu1 }
  0xef   : > { %v686_v10 = vsel %vm622_vm3, %v504_v63, %v654_v3  ;;  %vm637_vm6 = vcmp.gt.f32.partialorder %v565_v6, 0.0  ;;  %v669_v16 = vmul.f32 0.1, %v565_v6  ;;  %v559_v17 = vpop.f32.mrb[3].mxu1  ;;  %v568_v25 = vadd.f32 %v1829_v12, %v2092_v56 }
  0xf0   : > { %v716_v13 = vpack.c.bf16 %v686_v10, %v685_v8  ;;  %v684_v14 = vsel %vm620_vm4, %v496_v2, %v652_v5  ;;  %v1816_v15 = vpop.f32.mrb[4].mxu0  ;;  %vm635_vm7 = vcmp.gt.f32.partialorder %v557_v11, 0.0  ;;  %v667_v21 = vmul.f32 0.1, %v557_v11 }
  0xf1   : > { %v715_v18 = vpack.c.bf16 %v684_v14, %v683_v9  ;;  %v517_v19 = vadd.f32 %v1816_v15, %v2092_v56  ;;  %v508_v20 = vpop.f32.mrb[5].mxu0  ;;  %v2102_v24 = vsel %vm637_vm6, %v565_v6, %v669_v16  ;;  %v560_v26 = vadd.f32 %v2092_v56, %v559_v17 }
  0xf2   : > { %v509_v22 = vadd.f32 %v2092_v56, %v508_v20  ;;  %v1817_v23 = vpop.f32.mrb[6].mxu0  ;;  %v2108_v30 = vsel %vm635_vm7, %v557_v11, %v667_v21  ;;  %vm638_vm10 = vcmp.gt.f32.partialorder %v568_v25, 0.0  ;;  %v670_v35 = vmul.f32 0.1, %v568_v25 }
  0xf3   : > { %vm625_vm8 = vcmp.gt.f32.partialorder %v517_v19, 0.0  ;;  %v657_v27 = vmul.f32 0.1, %v517_v19  ;;  %v520_v28 = vadd.f32 %v1817_v23, %v2092_v56  ;;  %v511_v29 = vpop.f32.mrb[7].mxu0  ;;  %1850 = vmatprep.mubr.msk.bf16.mxu1 %vm770_vm5, %v715_v18  ;;  %vm636_vm13 = vcmp.gt.f32.partialorder %v560_v26, 0.0 }
  0xf4   : > { %vm623_vm9 = vcmp.gt.f32.partialorder %v509_v22, 0.0  ;;  %v655_v31 = vmul.f32 0.1, %v509_v22  ;;  %v512_v32 = vadd.f32 %v2092_v56, %v511_v29  ;;  %1851 = vmatmul.mubr.msk.bf16.vlgmr.msra.gmra.mrb[16].mxu1 %vm770_vm5, %v716_v13  ;;  %v1832_v36 = vpop.f32.mrb[4].mxu1  ;;  %v2112_v41 = vsel %vm638_vm10, %v568_v25, %v670_v35 }
  0xf5   : > { %v689_v33 = vsel %vm625_vm8, %v517_v19, %v657_v27  ;;  %vm626_vm11 = vcmp.gt.f32.partialorder %v520_v28, 0.0  ;;  %v658_v34 = vmul.f32 0.1, %v520_v28  ;;  %v572_v39 = vpop.f32.mrb[5].mxu1  ;;  %v668_v42 = vmul.f32 0.1, %v560_v26 }
  0xf6   : > { %v687_v37 = vsel %vm623_vm9, %v509_v22, %v655_v31  ;;  %vm624_vm12 = vcmp.gt.f32.partialorder %v512_v32, 0.0  ;;  %v656_v38 = vmul.f32 0.1, %v512_v32  ;;  %v581_v43 = vadd.f32 %v1832_v36, %v2092_v56  ;;  %v1833_v44 = vpop.f32.mrb[6].mxu1 }
  0xf7   : > { %v690_v40 = vsel %vm626_vm11, %v520_v28, %v658_v34  ;;  %v724_v48 = vpack.c.bf16 %v2112_v41, %v2102_v24  ;;  %v573_v49 = vadd.f32 %v2092_v56, %v572_v39  ;;  %v575_v50 = vpop.f32.mrb[7].mxu1  ;;  %v2120_v54 = vsel %vm636_vm13, %v560_v26, %v668_v42 }
  0xf8   : > { %v718_v45 = vpack.c.bf16 %v690_v40, %v689_v33  ;;  %v688_v46 = vsel %vm624_vm12, %v512_v32, %v656_v38  ;;  %v1820_v47 = vpop.f32.mrb[8].mxu0  ;;  %vm641_vm14 = vcmp.gt.f32.partialorder %v581_v43, 0.0  ;;  %v723_v58 = vpack.c.bf16 %v2120_v54, %v2108_v30  ;;  %v2176_v30 = vld [vmem:[%s2445_s4] ss:$0 sm:$0xff] }
  0xf9   : > { %v717_v51 = vpack.c.bf16 %v688_v46, %v687_v37  ;;  %v533_v52 = vadd.f32 %v1820_v47, %v2092_v56  ;;  %v524_v53 = vpop.f32.mrb[9].mxu0  ;;  %v673_v59 = vmul.f32 0.1, %v581_v43  ;;  %vm639_vm15 = vcmp.gt.f32.partialorder %v573_v49, 0.0 }
  0xfa   : > { %v525_v55 = vadd.f32 %v2092_v56, %v524_v53  ;;  %v1821_v57 = vpop.f32.mrb[10].mxu0  ;;  %v671_v63 = vmul.f32 0.1, %v573_v49  ;;  %v584_v9 = vadd.f32 %v1833_v44, %v2092_v56  ;;  %v576_v12 = vadd.f32 %v2092_v56, %v575_v50 }
  0xfb   : > { %vm629_vm1 = vcmp.gt.f32.partialorder %v533_v52, 0.0  ;;  %v661_v60 = vmul.f32 0.1, %v533_v52  ;;  %v536_v61 = vadd.f32 %v1821_v57, %v2092_v56  ;;  %v527_v62 = vpop.f32.mrb[11].mxu0  ;;  %1854 = vmatprep.mubr.msk.bf16.mxu1 %vm770_vm5, %v717_v51  ;;  %v2130_v2 = vsel %vm641_vm14, %v581_v43, %v673_v59 }
  0xfc   : > { %vm627_vm2 = vcmp.gt.f32.partialorder %v525_v55, 0.0  ;;  %v659_v0 = vmul.f32 0.1, %v525_v55  ;;  %v528_v1 = vadd.f32 %v2092_v56, %v527_v62  ;;  %1855 = vmatmul.mubr.msk.bf16.gmra.mrb[20].mxu1 %vm770_vm5, %v718_v45  ;;  %v2132_v5 = vsel %vm639_vm15, %v573_v49, %v671_v63  ;;  %v1836_v6 = vpop.f32.mrb[8].mxu1 }
  0xfd   : > { %v693_v3 = vsel %vm629_vm1, %v533_v52, %v661_v60  ;;  %vm630_vm3 = vcmp.gt.f32.partialorder %v536_v61, 0.0  ;;  %v662_v4 = vmul.f32 0.1, %v536_v61  ;;  %v588_v10 = vpop.f32.mrb[9].mxu1  ;;  %v597_v13 = vadd.f32 %v1836_v6, %v2092_v56 }
  0xfe   : > { %v691_v7 = vsel %vm627_vm2, %v525_v55, %v659_v0  ;;  %vm628_vm4 = vcmp.gt.f32.partialorder %v528_v1, 0.0  ;;  %v660_v8 = vmul.f32 0.1, %v528_v1  ;;  %v589_v14 = vadd.f32 %v2092_v56, %v588_v10  ;;  %v1837_v15 = vpop.f32.mrb[10].mxu1 }
  0xff   : > { %v694_v11 = vsel %vm630_vm3, %v536_v61, %v662_v4  ;;  %vm642_vm6 = vcmp.gt.f32.partialorder %v584_v9, 0.0  ;;  %v674_v19 = vmul.f32 0.1, %v584_v9  ;;  %v591_v20 = vpop.f32.mrb[11].mxu1  ;;  %vm640_vm7 = vcmp.gt.f32.partialorder %v576_v12, 0.0 }
 0x100   : > { %v720_v16 = vpack.c.bf16 %v694_v11, %v693_v3  ;;  %v692_v17 = vsel %vm628_vm4, %v528_v1, %v660_v8  ;;  %v1824_v18 = vpop.f32.mrb[12].mxu0  ;;  %v672_v25 = vmul.f32 0.1, %v576_v12  ;;  %vm645_vm8 = vcmp.gt.f32.partialorder %v597_v13, 0.0 }
 0x101   : > { %v719_v21 = vpack.c.bf16 %v692_v17, %v691_v7  ;;  %v549_v22 = vadd.f32 %v1824_v18, %v2092_v56  ;;  %v540_v23 = vpop.f32.mrb[13].mxu0  ;;  %v2140_v28 = vsel %vm642_vm6, %v584_v9, %v674_v19  ;;  %v677_v29 = vmul.f32 0.1, %v597_v13 }
 0x102   : > { %v541_v26 = vadd.f32 %v2092_v56, %v540_v23  ;;  %v1825_v27 = vpop.f32.mrb[14].mxu0  ;;  %v726_v34 = vpack.c.bf16 %v2140_v28, %v2130_v2  ;;  %v704_v37 = vsel %vm640_vm7, %v576_v12, %v672_v25  ;;  %vm643_vm13 = vcmp.gt.f32.partialorder %v589_v14, 0.0 }
 0x103   : > { %vm633_vm9 = vcmp.gt.f32.partialorder %v549_v22, 0.0  ;;  %v665_v31 = vmul.f32 0.1, %v549_v22  ;;  %v552_v32 = vadd.f32 %v1825_v27, %v2092_v56  ;;  %v543_v33 = vpop.f32.mrb[15].mxu0  ;;  %1858 = vmatprep.mubr.msk.bf16.mxu1 %vm770_vm5, %v719_v21  ;;  %v725_v40 = vpack.c.bf16 %v704_v37, %v2132_v5 }
 0x104   : > { %vm631_vm10 = vcmp.gt.f32.partialorder %v541_v26, 0.0  ;;  %v663_v35 = vmul.f32 0.1, %v541_v26  ;;  %v544_v36 = vadd.f32 %v2092_v56, %v543_v33  ;;  %1859 = vmatmul.mubr.msk.bf16.gmra.mrb[24].mxu1 %vm770_vm5, %v720_v16  ;;  %v1840_v42 = vpop.f32.mrb[12].mxu1  ;;  %v709_v45 = vsel %vm645_vm8, %v597_v13, %v677_v29 }
 0x105   : > { %v697_v38 = vsel %vm633_vm9, %v549_v22, %v665_v31  ;;  %vm634_vm11 = vcmp.gt.f32.partialorder %v552_v32, 0.0  ;;  %v666_v39 = vmul.f32 0.1, %v552_v32  ;;  %v604_v46 = vpop.f32.mrb[13].mxu1  ;;  %v675_v49 = vmul.f32 0.1, %v589_v14 }
 0x106   : > { %v695_v43 = vsel %vm631_vm10, %v541_v26, %v663_v35  ;;  %vm632_vm12 = vcmp.gt.f32.partialorder %v544_v36, 0.0  ;;  %v664_v44 = vmul.f32 0.1, %v544_v36  ;;  %v600_v50 = vadd.f32 %v1837_v15, %v2092_v56  ;;  %v1841_v51 = vpop.f32.mrb[14].mxu1 }
 0x107   : > { %v698_v47 = vsel %vm634_vm11, %v552_v32, %v666_v39  ;;  %v592_v55 = vadd.f32 %v2092_v56, %v591_v20  ;;  %v613_v57 = vadd.f32 %v1840_v42, %v2092_v56  ;;  %v607_v59 = vpop.f32.mrb[15].mxu1  ;;  %v707_v61 = vsel %vm643_vm13, %v589_v14, %v675_v49 }
 0x108   : > { %v722_v52 = vpack.c.bf16 %v698_v47, %v697_v38  ;;  %v696_v53 = vsel %vm632_vm12, %v544_v36, %v664_v44  ;;  %vm646_vm14 = vcmp.gt.f32.partialorder %v600_v50, 0.0  ;;  %v678_v62 = vmul.f32 0.1, %v600_v50 }
 0x109   : > { %v721_v60 = vpack.c.bf16 %v696_v53, %v695_v43  ;;  %vm644_vm15 = vcmp.gt.f32.partialorder %v592_v55, 0.0  ;;  %v676_v63 = vmul.f32 0.1, %v592_v55  ;;  %vm649_vm1 = vcmp.gt.f32.partialorder %v613_v57, 0.0 }
 0x10a   : > { %v681_v0 = vmul.f32 0.1, %v613_v57  ;;  %v710_v1 = vsel %vm646_vm14, %v600_v50, %v678_v62  ;;  %v605_v2 = vadd.f32 %v2092_v56, %v604_v46  ;;  %v616_v3 = vadd.f32 %v1841_v51, %v2092_v56 }
 0x10b   : > { %1862 = vmatprep.mubr.msk.bf16.mxu1 %vm770_vm5, %v721_v60  ;;  %v608_v4 = vadd.f32 %v2092_v56, %v607_v59  ;;  %v728_v5 = vpack.c.bf16 %v710_v1, %v709_v45  ;;  %v708_v6 = vsel %vm644_vm15, %v592_v55, %v676_v63 }
 0x10c   : > { %1863 = vmatmul.mubr.msk.bf16.gmra.mrb[28].mxu1 %vm770_vm5, %v722_v52  ;;  %v727_v7 = vpack.c.bf16 %v708_v6, %v707_v61  ;;  %vm647_vm2 = vcmp.gt.f32.partialorder %v605_v2, 0.0  ;;  %v679_v8 = vmul.f32 0.1, %v605_v2  ;;  %vm650_vm3 = vcmp.gt.f32.partialorder %v616_v3, 0.0 }
 0x10d   : > { %1866 = vmatprep.mubr.msk.bf16.mxu1 %vm770_vm5, %v723_v58  ;;  %v713_v9 = vsel %vm649_vm1, %v613_v57, %v681_v0  ;;  %v682_v10 = vmul.f32 0.1, %v616_v3  ;;  %vm648_vm4 = vcmp.gt.f32.partialorder %v608_v4, 0.0  ;;  %v680_v11 = vmul.f32 0.1, %v608_v4 }
 0x10e   : > { %v711_v12 = vsel %vm647_vm2, %v605_v2, %v679_v8 }
 0x10f   : > { %v714_v13 = vsel %vm650_vm3, %v616_v3, %v682_v10  ;;  %v712_v56 = vsel %vm648_vm4, %v608_v4, %v680_v11 }
 0x110   : > { %v730_v14 = vpack.c.bf16 %v714_v13, %v713_v9  ;;  %v729_v15 = vpack.c.bf16 %v712_v56, %v711_v12 }
 0x114   : > { %1867 = vmatmul.mubr.msk.bf16.gmra.mrb[32].mxu1 %vm770_vm5, %v724_v48 }
 0x115   : > { %1870 = vmatprep.mubr.msk.bf16.mxu1 %vm770_vm5, %v725_v40 }
 0x11c   : > { %1871 = vmatmul.mubr.msk.bf16.gmra.mrb[36].mxu1 %vm770_vm5, %v726_v34 }
 0x11d   : > { %1874 = vmatprep.mubr.msk.bf16.mxu1 %vm770_vm5, %v727_v7 }
 0x124   : > { %1875 = vmatmul.mubr.msk.bf16.gmra.mrb[40].mxu1 %vm770_vm5, %v728_v5 }
 0x125   : > { %1878 = vmatprep.mubr.msk.bf16.mxu1 %vm770_vm5, %v729_v15 }
 0x12c   : > { %1879 = vmatmul.mubr.msk.bf16.gmra.mrb[44].mxu1 %vm770_vm5, %v730_v14 }
 0x1c7   : > { %v1852_v24 = vpop.f32.mrb[16].mxu1 }
 0x1c8   : > { %v862_v41 = vadd.f32 %v1852_v24, %v2176_v30  ;;  %v853_v48 = vpop.f32.mrb[17].mxu1 }
 0x1c9   : > { %v854_v54 = vadd.f32 %v2176_v30, %v853_v48  ;;  %v1853_v58 = vpop.f32.mrb[18].mxu1 }
 0x1ca   : > { %v1014_v16 = vmul.f32 0.1, %v862_v41  ;;  %v865_v17 = vadd.f32 %v1853_v58, %v2176_v30  ;;  %v856_v18 = vpop.f32.mrb[19].mxu1  ;;  %vm982_vm6 = vcmp.gt.f32.partialorder %v862_v41, 0.0 }
 0x1cb   : > { %v1012_v19 = vmul.f32 0.1, %v854_v54  ;;  %v857_v20 = vadd.f32 %v2176_v30, %v856_v18  ;;  %vm980_vm5 = vcmp.gt.f32.partialorder %v854_v54, 0.0 }
 0x1cc   : > { %vm983_vm7 = vcmp.gt.f32.partialorder %v865_v17, 0.0  ;;  %v1015_v21 = vmul.f32 0.1, %v865_v17  ;;  %v1046_v23 = vsel %vm982_vm6, %v862_v41, %v1014_v16 }
 0x1cd   : > { %vm981_vm8 = vcmp.gt.f32.partialorder %v857_v20, 0.0  ;;  %v1013_v22 = vmul.f32 0.1, %v857_v20  ;;  %v1044_v26 = vsel %vm980_vm5, %v854_v54, %v1012_v19 }
 0x1ce   : > { %v1047_v25 = vsel %vm983_vm7, %v865_v17, %v1015_v21 }
 0x1cf   : > { %v1077_v27 = vpack.c.bf16 %v1047_v25, %v1046_v23  ;;  %v1045_v28 = vsel %vm981_vm8, %v857_v20, %v1013_v22  ;;  %v1856_v29 = vpop.f32.mrb[20].mxu1 }
 0x1d0   : > { %v1076_v31 = vpack.c.bf16 %v1045_v28, %v1044_v26  ;;  %v878_v32 = vadd.f32 %v1856_v29, %v2176_v30  ;;  %v869_v33 = vpop.f32.mrb[21].mxu1 }
 0x1d1   : > { %v870_v34 = vadd.f32 %v2176_v30, %v869_v33  ;;  %v1857_v35 = vpop.f32.mrb[22].mxu1 }
 0x1d2   : > { %v1018_v36 = vmul.f32 0.1, %v878_v32  ;;  %v881_v37 = vadd.f32 %v1857_v35, %v2176_v30  ;;  %v872_v38 = vpop.f32.mrb[23].mxu1  ;;  %1886 = vmatprep.mubr.msk.bf16.mxu0 %vm409_vm0, %v1076_v31  ;;  %vm986_vm9 = vcmp.gt.f32.partialorder %v878_v32, 0.0 }
 0x1d3   : > { %v1016_v39 = vmul.f32 0.1, %v870_v34  ;;  %v873_v40 = vadd.f32 %v2176_v30, %v872_v38  ;;  %1887 = vmatmul.mubr.msk.bf16.vlgmr.msra.gmra.mrb[16].mxu0 %vm409_vm0, %v1077_v27  ;;  %vm984_vm10 = vcmp.gt.f32.partialorder %v870_v34, 0.0 }
 0x1d4   : > { %vm987_vm11 = vcmp.gt.f32.partialorder %v881_v37, 0.0  ;;  %v1019_v42 = vmul.f32 0.1, %v881_v37  ;;  %v1050_v44 = vsel %vm986_vm9, %v878_v32, %v1018_v36 }
 0x1d5   : > { %vm985_vm12 = vcmp.gt.f32.partialorder %v873_v40, 0.0  ;;  %v1017_v43 = vmul.f32 0.1, %v873_v40  ;;  %v1048_v46 = vsel %vm984_vm10, %v870_v34, %v1016_v39 }
 0x1d6   : > { %v1051_v45 = vsel %vm987_vm11, %v881_v37, %v1019_v42 }
 0x1d7   : > { %v1079_v47 = vpack.c.bf16 %v1051_v45, %v1050_v44  ;;  %v1049_v49 = vsel %vm985_vm12, %v873_v40, %v1017_v43  ;;  %v1860_v50 = vpop.f32.mrb[24].mxu1 }
 0x1d8   : > { %v1078_v51 = vpack.c.bf16 %v1049_v49, %v1048_v46  ;;  %v894_v52 = vadd.f32 %v1860_v50, %v2176_v30  ;;  %v885_v53 = vpop.f32.mrb[25].mxu1 }
 0x1d9   : > { %v886_v55 = vadd.f32 %v2176_v30, %v885_v53  ;;  %v1861_v57 = vpop.f32.mrb[26].mxu1 }
 0x1da   : > { %v1022_v59 = vmul.f32 0.1, %v894_v52  ;;  %v897_v60 = vadd.f32 %v1861_v57, %v2176_v30  ;;  %v888_v61 = vpop.f32.mrb[27].mxu1  ;;  %1890 = vmatprep.mubr.msk.bf16.mxu0 %vm409_vm0, %v1078_v51  ;;  %vm990_vm13 = vcmp.gt.f32.partialorder %v894_v52, 0.0 }
 0x1db   : > { %v1020_v62 = vmul.f32 0.1, %v886_v55  ;;  %v889_v63 = vadd.f32 %v2176_v30, %v888_v61  ;;  %1891 = vmatmul.mubr.msk.bf16.gmra.mrb[20].mxu0 %vm409_vm0, %v1079_v47  ;;  %vm988_vm14 = vcmp.gt.f32.partialorder %v886_v55, 0.0 }
 0x1dc   : > { %vm991_vm15 = vcmp.gt.f32.partialorder %v897_v60, 0.0  ;;  %v1023_v0 = vmul.f32 0.1, %v897_v60  ;;  %v1054_v2 = vsel %vm990_vm13, %v894_v52, %v1022_v59 }
 0x1dd   : > { %vm989_vm1 = vcmp.gt.f32.partialorder %v889_v63, 0.0  ;;  %v1021_v1 = vmul.f32 0.1, %v889_v63  ;;  %v1052_v4 = vsel %vm988_vm14, %v886_v55, %v1020_v62 }
 0x1de   : > { %v1055_v3 = vsel %vm991_vm15, %v897_v60, %v1023_v0 }
 0x1df   : > { %v1081_v5 = vpack.c.bf16 %v1055_v3, %v1054_v2  ;;  %v1053_v6 = vsel %vm989_vm1, %v889_v63, %v1021_v1  ;;  %v1864_v7 = vpop.f32.mrb[28].mxu1 }
 0x1e0   : > { %v1080_v8 = vpack.c.bf16 %v1053_v6, %v1052_v4  ;;  %v910_v9 = vadd.f32 %v1864_v7, %v2176_v30  ;;  %v901_v10 = vpop.f32.mrb[29].mxu1 }
 0x1e1   : > { %v902_v11 = vadd.f32 %v2176_v30, %v901_v10  ;;  %v1865_v12 = vpop.f32.mrb[30].mxu1 }
 0x1e2   : > { %v1026_v13 = vmul.f32 0.1, %v910_v9  ;;  %v913_v56 = vadd.f32 %v1865_v12, %v2176_v30  ;;  %v904_v14 = vpop.f32.mrb[31].mxu1  ;;  %1894 = vmatprep.mubr.msk.bf16.mxu0 %vm409_vm0, %v1080_v8  ;;  %vm994_vm2 = vcmp.gt.f32.partialorder %v910_v9, 0.0 }
 0x1e3   : > { %v1024_v15 = vmul.f32 0.1, %v902_v11  ;;  %v905_v24 = vadd.f32 %v2176_v30, %v904_v14  ;;  %1895 = vmatmul.mubr.msk.bf16.gmra.mrb[24].mxu0 %vm409_vm0, %v1081_v5  ;;  %vm992_vm3 = vcmp.gt.f32.partialorder %v902_v11, 0.0 }
 0x1e4   : > { %vm995_vm4 = vcmp.gt.f32.partialorder %v913_v56, 0.0  ;;  %v1027_v41 = vmul.f32 0.1, %v913_v56  ;;  %v1058_v54 = vsel %vm994_vm2, %v910_v9, %v1026_v13 }
 0x1e5   : > { %vm993_vm6 = vcmp.gt.f32.partialorder %v905_v24, 0.0  ;;  %v1025_v48 = vmul.f32 0.1, %v905_v24  ;;  %v1056_v16 = vsel %vm992_vm3, %v902_v11, %v1024_v15 }
 0x1e6   : > { %v1059_v58 = vsel %vm995_vm4, %v913_v56, %v1027_v41 }
 0x1e7   : > { %v1083_v17 = vpack.c.bf16 %v1059_v58, %v1058_v54  ;;  %v1057_v18 = vsel %vm993_vm6, %v905_v24, %v1025_v48  ;;  %v1868_v19 = vpop.f32.mrb[32].mxu1 }
 0x1e8   : > { %v1082_v20 = vpack.c.bf16 %v1057_v18, %v1056_v16  ;;  %v926_v21 = vadd.f32 %v1868_v19, %v2176_v30  ;;  %v917_v22 = vpop.f32.mrb[33].mxu1 }
 0x1e9   : > { %v918_v23 = vadd.f32 %v2176_v30, %v917_v22  ;;  %v1869_v25 = vpop.f32.mrb[34].mxu1 }
 0x1ea   : > { %v1030_v26 = vmul.f32 0.1, %v926_v21  ;;  %v929_v27 = vadd.f32 %v1869_v25, %v2176_v30  ;;  %v920_v28 = vpop.f32.mrb[35].mxu1  ;;  %1898 = vmatprep.mubr.msk.bf16.mxu0 %vm409_vm0, %v1082_v20  ;;  %vm998_vm5 = vcmp.gt.f32.partialorder %v926_v21, 0.0 }
 0x1eb   : > { %v1028_v29 = vmul.f32 0.1, %v918_v23  ;;  %v921_v31 = vadd.f32 %v2176_v30, %v920_v28  ;;  %1899 = vmatmul.mubr.msk.bf16.gmra.mrb[28].mxu0 %vm409_vm0, %v1083_v17  ;;  %vm996_vm7 = vcmp.gt.f32.partialorder %v918_v23, 0.0 }
 0x1ec   : > { %vm999_vm8 = vcmp.gt.f32.partialorder %v929_v27, 0.0  ;;  %v1031_v32 = vmul.f32 0.1, %v929_v27  ;;  %v1062_v34 = vsel %vm998_vm5, %v926_v21, %v1030_v26 }
 0x1ed   : > { %vm997_vm9 = vcmp.gt.f32.partialorder %v921_v31, 0.0  ;;  %v1029_v33 = vmul.f32 0.1, %v921_v31  ;;  %v1060_v36 = vsel %vm996_vm7, %v918_v23, %v1028_v29 }
 0x1ee   : > { %v1063_v35 = vsel %vm999_vm8, %v929_v27, %v1031_v32 }
 0x1ef   : > { %v1085_v37 = vpack.c.bf16 %v1063_v35, %v1062_v34  ;;  %v1061_v38 = vsel %vm997_vm9, %v921_v31, %v1029_v33  ;;  %v1872_v39 = vpop.f32.mrb[36].mxu1  ;;  %vm1459_vm9 = vcmask 130048  }
 0x1f0   : > { %v1084_v40 = vpack.c.bf16 %v1061_v38, %v1060_v36  ;;  %v942_v42 = vadd.f32 %v1872_v39, %v2176_v30  ;;  %v933_v43 = vpop.f32.mrb[37].mxu1  ;;  %v2237_v39 = vld [vmem:[%s2448_s7] ss:$0 sm:$0xff] }
 0x1f1   : > { %v934_v44 = vadd.f32 %v2176_v30, %v933_v43  ;;  %v1873_v45 = vpop.f32.mrb[38].mxu1 }
 0x1f2   : > { %v1034_v46 = vmul.f32 0.1, %v942_v42  ;;  %v945_v47 = vadd.f32 %v1873_v45, %v2176_v30  ;;  %v936_v49 = vpop.f32.mrb[39].mxu1  ;;  %1902 = vmatprep.mubr.msk.bf16.mxu0 %vm409_vm0, %v1084_v40  ;;  %vm1002_vm10 = vcmp.gt.f32.partialorder %v942_v42, 0.0 }
 0x1f3   : > { %v1032_v50 = vmul.f32 0.1, %v934_v44  ;;  %v937_v51 = vadd.f32 %v2176_v30, %v936_v49  ;;  %1903 = vmatmul.mubr.msk.bf16.gmra.mrb[32].mxu0 %vm409_vm0, %v1085_v37  ;;  %vm1000_vm11 = vcmp.gt.f32.partialorder %v934_v44, 0.0 }
 0x1f4   : > { %vm1003_vm12 = vcmp.gt.f32.partialorder %v945_v47, 0.0  ;;  %v1035_v52 = vmul.f32 0.1, %v945_v47  ;;  %v1066_v55 = vsel %vm1002_vm10, %v942_v42, %v1034_v46 }
 0x1f5   : > { %vm1001_vm13 = vcmp.gt.f32.partialorder %v937_v51, 0.0  ;;  %v1033_v53 = vmul.f32 0.1, %v937_v51  ;;  %v1064_v59 = vsel %vm1000_vm11, %v934_v44, %v1032_v50 }
 0x1f6   : > { %v1067_v57 = vsel %vm1003_vm12, %v945_v47, %v1035_v52 }
 0x1f7   : > { %v1087_v60 = vpack.c.bf16 %v1067_v57, %v1066_v55  ;;  %v1065_v61 = vsel %vm1001_vm13, %v937_v51, %v1033_v53  ;;  %v1876_v62 = vpop.f32.mrb[40].mxu1 }
 0x1f8   : > { %v1086_v63 = vpack.c.bf16 %v1065_v61, %v1064_v59  ;;  %v958_v0 = vadd.f32 %v1876_v62, %v2176_v30  ;;  %v949_v1 = vpop.f32.mrb[41].mxu1 }
 0x1f9   : > { %v950_v2 = vadd.f32 %v2176_v30, %v949_v1  ;;  %v1877_v3 = vpop.f32.mrb[42].mxu1 }
 0x1fa   : > { %v1038_v4 = vmul.f32 0.1, %v958_v0  ;;  %v961_v5 = vadd.f32 %v1877_v3, %v2176_v30  ;;  %v952_v6 = vpop.f32.mrb[43].mxu1  ;;  %1906 = vmatprep.mubr.msk.bf16.mxu0 %vm409_vm0, %v1086_v63  ;;  %vm1006_vm14 = vcmp.gt.f32.partialorder %v958_v0, 0.0 }
 0x1fb   : > { %v1036_v7 = vmul.f32 0.1, %v950_v2  ;;  %v953_v8 = vadd.f32 %v2176_v30, %v952_v6  ;;  %1907 = vmatmul.mubr.msk.bf16.gmra.mrb[36].mxu0 %vm409_vm0, %v1087_v60  ;;  %vm1004_vm15 = vcmp.gt.f32.partialorder %v950_v2, 0.0 }
 0x1fc   : > { %vm1007_vm1 = vcmp.gt.f32.partialorder %v961_v5, 0.0  ;;  %v1039_v9 = vmul.f32 0.1, %v961_v5  ;;  %v1070_v11 = vsel %vm1006_vm14, %v958_v0, %v1038_v4 }
 0x1fd   : > { %vm1005_vm2 = vcmp.gt.f32.partialorder %v953_v8, 0.0  ;;  %v1037_v10 = vmul.f32 0.1, %v953_v8  ;;  %v1068_v13 = vsel %vm1004_vm15, %v950_v2, %v1036_v7 }
 0x1fe   : > { %v1071_v12 = vsel %vm1007_vm1, %v961_v5, %v1039_v9 }
 0x1ff   : > { %v1089_v56 = vpack.c.bf16 %v1071_v12, %v1070_v11  ;;  %v1069_v14 = vsel %vm1005_vm2, %v953_v8, %v1037_v10  ;;  %v1880_v15 = vpop.f32.mrb[44].mxu1 }
 0x200   : > { %v1088_v24 = vpack.c.bf16 %v1069_v14, %v1068_v13  ;;  %v974_v41 = vadd.f32 %v1880_v15, %v2176_v30  ;;  %v965_v48 = vpop.f32.mrb[45].mxu1 }
 0x201   : > { %v966_v54 = vadd.f32 %v2176_v30, %v965_v48  ;;  %v1881_v58 = vpop.f32.mrb[46].mxu1 }
 0x202   : > { %v1042_v16 = vmul.f32 0.1, %v974_v41  ;;  %v977_v17 = vadd.f32 %v1881_v58, %v2176_v30  ;;  %v968_v18 = vpop.f32.mrb[47].mxu1  ;;  %1910 = vmatprep.mubr.msk.bf16.mxu0 %vm409_vm0, %v1088_v24  ;;  %vm1010_vm3 = vcmp.gt.f32.partialorder %v974_v41, 0.0 }
 0x203   : > { %v1040_v19 = vmul.f32 0.1, %v966_v54  ;;  %v969_v20 = vadd.f32 %v2176_v30, %v968_v18  ;;  %1911 = vmatmul.mubr.msk.bf16.gmra.mrb[40].mxu0 %vm409_vm0, %v1089_v56  ;;  %vm1008_vm4 = vcmp.gt.f32.partialorder %v966_v54, 0.0  ;;  %v2229_v30 = vld [vmem:[%s2447_s6] ss:$0 sm:$0xff] }
 0x204   : > { %vm1011_vm6 = vcmp.gt.f32.partialorder %v977_v17, 0.0  ;;  %v1043_v21 = vmul.f32 0.1, %v977_v17  ;;  %v1074_v23 = vsel %vm1010_vm3, %v974_v41, %v1042_v16 }
 0x205   : > { %vm1009_vm5 = vcmp.gt.f32.partialorder %v969_v20, 0.0  ;;  %v1041_v22 = vmul.f32 0.1, %v969_v20  ;;  %v1072_v26 = vsel %vm1008_vm4, %v966_v54, %v1040_v19 }
 0x206   : > { %v1075_v25 = vsel %vm1011_vm6, %v977_v17, %v1043_v21 }
 0x207   : > { %v1091_v27 = vpack.c.bf16 %v1075_v25, %v1074_v23  ;;  %v1073_v28 = vsel %vm1009_vm5, %v969_v20, %v1041_v22 }
 0x208   : > { %v1090_v29 = vpack.c.bf16 %v1073_v28, %v1072_v26 }
 0x20a   : > { %1914 = vmatprep.mubr.msk.bf16.mxu0 %vm409_vm0, %v1090_v29 }
 0x20b   : > { %1915 = vmatmul.mubr.msk.bf16.gmra.mrb[44].mxu0 %vm409_vm0, %v1091_v27 }
 0x2a6   : > { %v1888_v31 = vpop.f32.mrb[16].mxu0 }
 0x2a7   : > { %v1206_v32 = vadd.f32 %v1888_v31, %v2229_v30  ;;  %v1197_v33 = vpop.f32.mrb[17].mxu0 }
 0x2a8   : > { %v1198_v34 = vadd.f32 %v2229_v30, %v1197_v33  ;;  %v1889_v35 = vpop.f32.mrb[18].mxu0 }
 0x2a9   : > { %v1358_v36 = vmul.f32 0.1, %v1206_v32  ;;  %v1209_v37 = vadd.f32 %v1889_v35, %v2229_v30  ;;  %v1200_v38 = vpop.f32.mrb[19].mxu0  ;;  %vm1326_vm7 = vcmp.gt.f32.partialorder %v1206_v32, 0.0 }
 0x2aa   : > { %v1356_v40 = vmul.f32 0.1, %v1198_v34  ;;  %v1201_v42 = vadd.f32 %v2229_v30, %v1200_v38  ;;  %vm1324_vm0 = vcmp.gt.f32.partialorder %v1198_v34, 0.0 }
 0x2ab   : > { %vm1327_vm8 = vcmp.gt.f32.partialorder %v1209_v37, 0.0  ;;  %v1359_v43 = vmul.f32 0.1, %v1209_v37  ;;  %v1390_v44 = vsel %vm1326_vm7, %v1206_v32, %v1358_v36 }
 0x2ac   : > { %vm1325_vm10 = vcmp.gt.f32.partialorder %v1201_v42, 0.0  ;;  %v1357_v45 = vmul.f32 0.1, %v1201_v42  ;;  %v1429_v46 = vmul.f32 %v2237_v39, %v1390_v44  ;;  %v1388_v47 = vsel %vm1324_vm0, %v1198_v34, %v1356_v40 }
 0x2ad   : > { %v1427_v49 = vmul.f32 %v2237_v39, %v1388_v47  ;;  %v1391_v50 = vsel %vm1327_vm8, %v1209_v37, %v1359_v43 }
 0x2ae   : > { %v1892_v51 = vpop.f32.mrb[20].mxu0  ;;  %v1466_v52 = vsel %vm1459_vm9, %v1429_v46, 0.0  ;;  %v1430_v53 = vmul.f32 %v2237_v39, %v1391_v50  ;;  %v1389_v55 = vsel %vm1325_vm10, %v1201_v42, %v1357_v45 }
 0x2af   : > { %v1222_v57 = vadd.f32 %v1892_v51, %v2229_v30  ;;  %1467 = vadd.xlane.f32.xlu1 %v1466_v52  ;;  %v1213_v59 = vpop.f32.mrb[21].mxu0  ;;  %v1460_v60 = vsel %vm1459_vm9, %v1427_v49, 0.0  ;;  %v1428_v61 = vmul.f32 %v2237_v39, %v1389_v55 }
 0x2b0   : > { %v1214_v62 = vadd.f32 %v2229_v30, %v1213_v59  ;;  %v1893_v63 = vpop.f32.mrb[22].mxu0  ;;  %1461 = vadd.xlane.f32.xlu0 %v1460_v60  ;;  %v1469_v5 = vsel %vm1459_vm9, %v1430_v53, 0.0 }
 0x2b1   : > { %vm1330_vm11 = vcmp.gt.f32.partialorder %v1222_v57, 0.0  ;;  %v1362_v0 = vmul.f32 0.1, %v1222_v57  ;;  %v1225_v1 = vadd.f32 %v1893_v63, %v2229_v30  ;;  %v1216_v2 = vpop.f32.mrb[23].mxu0  ;;  %v1463_v7 = vsel %vm1459_vm9, %v1428_v61, 0.0 }
 0x2b2   : > { %vm1328_vm12 = vcmp.gt.f32.partialorder %v1214_v62, 0.0  ;;  %v1360_v3 = vmul.f32 0.1, %v1214_v62  ;;  %v1217_v4 = vadd.f32 %v2229_v30, %v1216_v2 }
 0x2b3   : > { %vm1331_vm13 = vcmp.gt.f32.partialorder %v1225_v1, 0.0  ;;  %v1363_v6 = vmul.f32 0.1, %v1225_v1  ;;  %1470 = vadd.xlane.f32.xlu1 %v1469_v5  ;;  %v1394_v8 = vsel %vm1330_vm11, %v1222_v57, %v1362_v0 }
 0x2b4   : > { %vm1329_vm14 = vcmp.gt.f32.partialorder %v1217_v4, 0.0  ;;  %v1361_v9 = vmul.f32 0.1, %v1217_v4  ;;  %1464 = vadd.xlane.f32.xlu0 %v1463_v7  ;;  %v1433_v10 = vmul.f32 %v2237_v39, %v1394_v8  ;;  %v1392_v11 = vsel %vm1328_vm12, %v1214_v62, %v1360_v3 }
 0x2b5   : > { %v1395_v12 = vsel %vm1331_vm13, %v1225_v1, %v1363_v6  ;;  %v1431_v15 = vmul.f32 %v2237_v39, %v1392_v11 }
 0x2b6   : > { %v1896_v13 = vpop.f32.mrb[24].mxu0  ;;  %v1478_v56 = vsel %vm1459_vm9, %v1433_v10, 0.0  ;;  %v1434_v14 = vmul.f32 %v2237_v39, %v1395_v12  ;;  %v1393_v24 = vsel %vm1329_vm14, %v1217_v4, %v1361_v9 }
 0x2b7   : > { %v1238_v41 = vadd.f32 %v1896_v13, %v2229_v30  ;;  %v1229_v48 = vpop.f32.mrb[25].mxu0  ;;  %v1432_v54 = vmul.f32 %v2237_v39, %v1393_v24  ;;  %v1472_v23 = vsel %vm1459_vm9, %v1431_v15, 0.0 }
 0x2b8   : > { %v1230_v58 = vadd.f32 %v2229_v30, %v1229_v48  ;;  %v1897_v16 = vpop.f32.mrb[26].mxu0  ;;  %1479 = vadd.xlane.f32.xlu0 %v1478_v56  ;;  %v1481_v17 = vsel %vm1459_vm9, %v1434_v14, 0.0 }
 0x2b9   : > { %vm1334_vm15 = vcmp.gt.f32.partialorder %v1238_v41, 0.0  ;;  %v1366_v18 = vmul.f32 0.1, %v1238_v41  ;;  %v1241_v19 = vadd.f32 %v1897_v16, %v2229_v30  ;;  %1482 = vadd.xlane.f32.xlu1 %v1481_v17  ;;  %v1232_v20 = vpop.f32.mrb[27].mxu0  ;;  %v1475_v26 = vsel %vm1459_vm9, %v1432_v54, 0.0 }
 0x2ba   : > { %vm1332_vm1 = vcmp.gt.f32.partialorder %v1230_v58, 0.0  ;;  %v1364_v21 = vmul.f32 0.1, %v1230_v58  ;;  %v1233_v22 = vadd.f32 %v2229_v30, %v1232_v20 }
 0x2bb   : > { %vm1335_vm2 = vcmp.gt.f32.partialorder %v1241_v19, 0.0  ;;  %v1367_v25 = vmul.f32 0.1, %v1241_v19  ;;  %v1398_v27 = vsel %vm1334_vm15, %v1238_v41, %v1366_v18 }
 0x2bc   : > { %vm1333_vm3 = vcmp.gt.f32.partialorder %v1233_v22, 0.0  ;;  %v1365_v28 = vmul.f32 0.1, %v1233_v22  ;;  %1473 = vadd.xlane.f32.xlu0 %v1472_v23  ;;  %v1437_v29 = vmul.f32 %v2237_v39, %v1398_v27  ;;  %v1396_v31 = vsel %vm1332_vm1, %v1230_v58, %v1364_v21 }
 0x2bd   : > { %1476 = vadd.xlane.f32.xlu1 %v1475_v26  ;;  %v1399_v32 = vsel %vm1335_vm2, %v1241_v19, %v1367_v25  ;;  %v1435_v36 = vmul.f32 %v2237_v39, %v1396_v31 }
 0x2be   : > { %v1900_v33 = vpop.f32.mrb[28].mxu0  ;;  %v1490_v34 = vsel %vm1459_vm9, %v1437_v29, 0.0  ;;  %v1438_v35 = vmul.f32 %v2237_v39, %v1399_v32  ;;  %v1397_v37 = vsel %vm1333_vm3, %v1233_v22, %v1365_v28 }
 0x2bf   : > { %v1254_v38 = vadd.f32 %v1900_v33, %v2229_v30  ;;  %v1245_v40 = vpop.f32.mrb[29].mxu0  ;;  %v1436_v42 = vmul.f32 %v2237_v39, %v1397_v37  ;;  %v1484_v52 = vsel %vm1459_vm9, %v1435_v36, 0.0 }
 0x2c0   : > { %v1246_v43 = vadd.f32 %v2229_v30, %v1245_v40  ;;  %v1901_v44 = vpop.f32.mrb[30].mxu0  ;;  %1491 = vadd.xlane.f32.xlu0 %v1490_v34  ;;  %v1493_v45 = vsel %vm1459_vm9, %v1438_v35, 0.0 }
 0x2c1   : > { %vm1338_vm4 = vcmp.gt.f32.partialorder %v1254_v38, 0.0  ;;  %v1370_v46 = vmul.f32 0.1, %v1254_v38  ;;  %v1257_v47 = vadd.f32 %v1901_v44, %v2229_v30  ;;  %v1248_v49 = vpop.f32.mrb[31].mxu0  ;;  %1494 = vadd.xlane.f32.xlu1 %v1493_v45  ;;  %v1487_v55 = vsel %vm1459_vm9, %v1436_v42, 0.0 }
 0x2c2   : > { %vm1336_vm6 = vcmp.gt.f32.partialorder %v1246_v43, 0.0  ;;  %v1368_v50 = vmul.f32 0.1, %v1246_v43  ;;  %v1249_v51 = vadd.f32 %v2229_v30, %v1248_v49 }
 0x2c3   : > { %vm1339_vm5 = vcmp.gt.f32.partialorder %v1257_v47, 0.0  ;;  %v1371_v53 = vmul.f32 0.1, %v1257_v47  ;;  %v1402_v57 = vsel %vm1338_vm4, %v1254_v38, %v1370_v46 }
 0x2c4   : > { %vm1337_vm7 = vcmp.gt.f32.partialorder %v1249_v51, 0.0  ;;  %v1369_v59 = vmul.f32 0.1, %v1249_v51  ;;  %1485 = vadd.xlane.f32.xlu0 %v1484_v52  ;;  %v1441_v60 = vmul.f32 %v2237_v39, %v1402_v57  ;;  %v1400_v61 = vsel %vm1336_vm6, %v1246_v43, %v1368_v50 }
 0x2c5   : > { %1488 = vadd.xlane.f32.xlu1 %v1487_v55  ;;  %v1403_v62 = vsel %vm1339_vm5, %v1257_v47, %v1371_v53  ;;  %v1439_v2 = vmul.f32 %v2237_v39, %v1400_v61 }
 0x2c6   : > { %v1904_v63 = vpop.f32.mrb[32].mxu0  ;;  %v1502_v0 = vsel %vm1459_vm9, %v1441_v60, 0.0  ;;  %v1442_v1 = vmul.f32 %v2237_v39, %v1403_v62  ;;  %v1401_v3 = vsel %vm1337_vm7, %v1249_v51, %v1369_v59 }
 0x2c7   : > { %v1270_v4 = vadd.f32 %v1904_v63, %v2229_v30  ;;  %v1261_v5 = vpop.f32.mrb[33].mxu0  ;;  %v1440_v6 = vmul.f32 %v2237_v39, %v1401_v3  ;;  %v1496_v14 = vsel %vm1459_vm9, %v1439_v2, 0.0 }
 0x2c8   : > { %v1262_v7 = vadd.f32 %v2229_v30, %v1261_v5  ;;  %v1905_v8 = vpop.f32.mrb[34].mxu0  ;;  %1503 = vadd.xlane.f32.xlu0 %v1502_v0  ;;  %v1505_v9 = vsel %vm1459_vm9, %v1442_v1, 0.0 }
 0x2c9   : > { %vm1342_vm0 = vcmp.gt.f32.partialorder %v1270_v4, 0.0  ;;  %v1374_v10 = vmul.f32 0.1, %v1270_v4  ;;  %v1273_v11 = vadd.f32 %v1905_v8, %v2229_v30  ;;  %v1264_v12 = vpop.f32.mrb[35].mxu0  ;;  %1506 = vadd.xlane.f32.xlu1 %v1505_v9  ;;  %v1499_v24 = vsel %vm1459_vm9, %v1440_v6, 0.0 }
 0x2ca   : > { %vm1340_vm8 = vcmp.gt.f32.partialorder %v1262_v7, 0.0  ;;  %v1372_v13 = vmul.f32 0.1, %v1262_v7  ;;  %v1265_v56 = vadd.f32 %v2229_v30, %v1264_v12 }
 0x2cb   : > { %vm1343_vm10 = vcmp.gt.f32.partialorder %v1273_v11, 0.0  ;;  %v1375_v15 = vmul.f32 0.1, %v1273_v11  ;;  %v1406_v41 = vsel %vm1342_vm0, %v1270_v4, %v1374_v10 }
 0x2cc   : > { %vm1341_vm11 = vcmp.gt.f32.partialorder %v1265_v56, 0.0  ;;  %v1373_v48 = vmul.f32 0.1, %v1265_v56  ;;  %1497 = vadd.xlane.f32.xlu0 %v1496_v14  ;;  %v1445_v54 = vmul.f32 %v2237_v39, %v1406_v41  ;;  %v1404_v58 = vsel %vm1340_vm8, %v1262_v7, %v1372_v13 }
 0x2cd   : > { %1500 = vadd.xlane.f32.xlu1 %v1499_v24  ;;  %v1407_v16 = vsel %vm1343_vm10, %v1273_v11, %v1375_v15  ;;  %v1443_v20 = vmul.f32 %v2237_v39, %v1404_v58  ;;  %vm1590_vm8 = vcmask 7168  }
 0x2ce   : > { %v1908_v17 = vpop.f32.mrb[36].mxu0  ;;  %v1514_v18 = vsel %vm1459_vm9, %v1445_v54, 0.0  ;;  %v1446_v19 = vmul.f32 %v2237_v39, %v1407_v16  ;;  %v1405_v21 = vsel %vm1341_vm11, %v1265_v56, %v1373_v48 }
 0x2cf   : > { %v1286_v22 = vadd.f32 %v1908_v17, %v2229_v30  ;;  %v1277_v23 = vpop.f32.mrb[37].mxu0  ;;  %v1444_v25 = vmul.f32 %v2237_v39, %v1405_v21  ;;  %v1508_v35 = vsel %vm1459_vm9, %v1443_v20, 0.0 }
 0x2d0   : > { %v1278_v26 = vadd.f32 %v2229_v30, %v1277_v23  ;;  %v1909_v27 = vpop.f32.mrb[38].mxu0  ;;  %1515 = vadd.xlane.f32.xlu0 %v1514_v18  ;;  %v1517_v28 = vsel %vm1459_vm9, %v1446_v19, 0.0 }
 0x2d1   : > { %vm1346_vm12 = vcmp.gt.f32.partialorder %v1286_v22, 0.0  ;;  %v1378_v29 = vmul.f32 0.1, %v1286_v22  ;;  %v1289_v31 = vadd.f32 %v1909_v27, %v2229_v30  ;;  %v1280_v32 = vpop.f32.mrb[39].mxu0  ;;  %1518 = vadd.xlane.f32.xlu1 %v1517_v28  ;;  %v1511_v37 = vsel %vm1459_vm9, %v1444_v25, 0.0 }
 0x2d2   : > { %vm1344_vm13 = vcmp.gt.f32.partialorder %v1278_v26, 0.0  ;;  %v1376_v33 = vmul.f32 0.1, %v1278_v26  ;;  %v1281_v34 = vadd.f32 %v2229_v30, %v1280_v32 }
 0x2d3   : > { %vm1347_vm14 = vcmp.gt.f32.partialorder %v1289_v31, 0.0  ;;  %v1379_v36 = vmul.f32 0.1, %v1289_v31  ;;  %v1410_v38 = vsel %vm1346_vm12, %v1286_v22, %v1378_v29 }
 0x2d4   : > { %vm1345_vm15 = vcmp.gt.f32.partialorder %v1281_v34, 0.0  ;;  %v1377_v40 = vmul.f32 0.1, %v1281_v34  ;;  %1509 = vadd.xlane.f32.xlu0 %v1508_v35  ;;  %v1449_v42 = vmul.f32 %v2237_v39, %v1410_v38  ;;  %v1408_v43 = vsel %vm1344_vm13, %v1278_v26, %v1376_v33 }
 0x2d5   : > { %1512 = vadd.xlane.f32.xlu1 %v1511_v37  ;;  %v1411_v44 = vsel %vm1347_vm14, %v1289_v31, %v1379_v36  ;;  %v1447_v49 = vmul.f32 %v2237_v39, %v1408_v43  ;;  %v2333_v36 = vstv %s1556_s22 }
 0x2d6   : > { %v1912_v45 = vpop.f32.mrb[40].mxu0  ;;  %v1526_v46 = vsel %vm1459_vm9, %v1449_v42, 0.0  ;;  %v1450_v47 = vmul.f32 %v2237_v39, %v1411_v44  ;;  %v1409_v50 = vsel %vm1345_vm15, %v1281_v34, %v1377_v40 }
 0x2d7   : > { %v1302_v51 = vadd.f32 %v1912_v45, %v2229_v30  ;;  %v1293_v52 = vpop.f32.mrb[41].mxu0  ;;  %v1448_v53 = vmul.f32 %v2237_v39, %v1409_v50  ;;  %v1520_v1 = vsel %vm1459_vm9, %v1447_v49, 0.0 }
 0x2d8   : > { %v1294_v55 = vadd.f32 %v2229_v30, %v1293_v52  ;;  %v1913_v57 = vpop.f32.mrb[42].mxu0  ;;  %1527 = vadd.xlane.f32.xlu0 %v1526_v46  ;;  %v1529_v59 = vsel %vm1459_vm9, %v1450_v47, 0.0 }
 0x2d9   : > { %vm1350_vm1 = vcmp.gt.f32.partialorder %v1302_v51, 0.0  ;;  %v1382_v60 = vmul.f32 0.1, %v1302_v51  ;;  %v1305_v61 = vadd.f32 %v1913_v57, %v2229_v30  ;;  %v1296_v62 = vpop.f32.mrb[43].mxu0  ;;  %1530 = vadd.xlane.f32.xlu1 %v1529_v59  ;;  %v1523_v3 = vsel %vm1459_vm9, %v1448_v53, 0.0 }
 0x2da   : > { %vm1348_vm2 = vcmp.gt.f32.partialorder %v1294_v55, 0.0  ;;  %v1380_v63 = vmul.f32 0.1, %v1294_v55  ;;  %v1297_v0 = vadd.f32 %v2229_v30, %v1296_v62 }
 0x2db   : > { %vm1351_vm3 = vcmp.gt.f32.partialorder %v1305_v61, 0.0  ;;  %v1383_v2 = vmul.f32 0.1, %v1305_v61  ;;  %v1414_v4 = vsel %vm1350_vm1, %v1302_v51, %v1382_v60 }
 0x2dc   : > { %vm1349_vm4 = vcmp.gt.f32.partialorder %v1297_v0, 0.0  ;;  %v1381_v5 = vmul.f32 0.1, %v1297_v0  ;;  %1521 = vadd.xlane.f32.xlu0 %v1520_v1  ;;  %v1453_v6 = vmul.f32 %v2237_v39, %v1414_v4  ;;  %v1412_v7 = vsel %vm1348_vm2, %v1294_v55, %v1380_v63 }
 0x2dd   : > { %1524 = vadd.xlane.f32.xlu1 %v1523_v3  ;;  %v1415_v8 = vsel %vm1351_vm3, %v1305_v61, %v1383_v2  ;;  %v1451_v14 = vmul.f32 %v2237_v39, %v1412_v7 }
 0x2de   : > { %v1916_v9 = vpop.f32.mrb[44].mxu0  ;;  %v1538_v10 = vsel %vm1459_vm9, %v1453_v6, 0.0  ;;  %v1454_v11 = vmul.f32 %v2237_v39, %v1415_v8  ;;  %v1413_v12 = vsel %vm1349_vm4, %v1297_v0, %v1381_v5 }
 0x2df   : > { %v1318_v13 = vadd.f32 %v1916_v9, %v2229_v30  ;;  %v1309_v56 = vpop.f32.mrb[45].mxu0  ;;  %v1452_v15 = vmul.f32 %v2237_v39, %v1413_v12  ;;  %v1532_v20 = vsel %vm1459_vm9, %v1451_v14, 0.0 }
 0x2e0   : > { %v1310_v24 = vadd.f32 %v2229_v30, %v1309_v56  ;;  %v1917_v41 = vpop.f32.mrb[46].mxu0  ;;  %1539 = vadd.xlane.f32.xlu0 %v1538_v10  ;;  %v1541_v48 = vsel %vm1459_vm9, %v1454_v11, 0.0 }
 0x2e1   : > { %vm1354_vm6 = vcmp.gt.f32.partialorder %v1318_v13, 0.0  ;;  %v1386_v54 = vmul.f32 0.1, %v1318_v13  ;;  %v1321_v58 = vadd.f32 %v1917_v41, %v2229_v30  ;;  %v1312_v16 = vpop.f32.mrb[47].mxu0  ;;  %1542 = vadd.xlane.f32.xlu1 %v1541_v48  ;;  %v1535_v21 = vsel %vm1459_vm9, %v1452_v15, 0.0 }
 0x2e2   : > { %vm1352_vm5 = vcmp.gt.f32.partialorder %v1310_v24, 0.0  ;;  %v1384_v17 = vmul.f32 0.1, %v1310_v24  ;;  %v1313_v18 = vadd.f32 %v2229_v30, %v1312_v16 }
 0x2e3   : > { %vm1355_vm7 = vcmp.gt.f32.partialorder %v1321_v58, 0.0  ;;  %v1387_v19 = vmul.f32 0.1, %v1321_v58  ;;  %v1418_v25 = vsel %vm1354_vm6, %v1318_v13, %v1386_v54 }
 0x2e4   : > { %vm1353_vm0 = vcmp.gt.f32.partialorder %v1313_v18, 0.0  ;;  %v1385_v22 = vmul.f32 0.1, %v1313_v18  ;;  %1533 = vadd.xlane.f32.xlu0 %v1532_v20  ;;  %v1416_v23 = vsel %vm1352_vm5, %v1310_v24, %v1384_v17  ;;  %v1457_v31 = vmul.f32 %v2237_v39, %v1418_v25 }
 0x2e5   : > { %1536 = vadd.xlane.f32.xlu1 %v1535_v21  ;;  %v1455_v26 = vmul.f32 %v2237_v39, %v1416_v23  ;;  %v1419_v28 = vsel %vm1355_vm7, %v1321_v58, %v1387_v19 }
 0x2e6   : > { %v1417_v27 = vsel %vm1353_vm0, %v1313_v18, %v1385_v22  ;;  %v1458_v33 = vmul.f32 %v2237_v39, %v1419_v28  ;;  %v1550_v34 = vsel %vm1459_vm9, %v1457_v31, 0.0 }
 0x2e7   : > { %v1544_v30 = vsel %vm1459_vm9, %v1455_v26, 0.0  ;;  %v1456_v29 = vmul.f32 %v2237_v39, %v1417_v27 }
 0x2e8   : > { %1545 = vadd.xlane.f32.xlu0 %v1544_v30  ;;  %v1553_v35 = vsel %vm1459_vm9, %v1458_v33, 0.0 }
 0x2e9   : > { %v1547_v32 = vsel %vm1459_vm9, %v1456_v29, 0.0 }
 0x2ea   : > { %1548 = vadd.xlane.f32.xlu1 %v1547_v32 }
 0x2ec   : > { %1551 = vadd.xlane.f32.xlu0 %v1550_v34 }
 0x2ee   : > { %1554 = vadd.xlane.f32.xlu1 %v1553_v35 }
 0x33c   : > { %v1468_v39 = vpop.xlane.xlu1 %1467 }
 0x33d   : > { %v1560_v37 = vadd.f32 %v2333_v36, %v1468_v39  ;;  %v1462_v38 = vpop.xlane.xlu0 %1461 }
 0x33e   : > { %v1558_v40 = vadd.f32 %v2333_v36, %v1462_v38 }
 0x33f   : > { %1593 = vst.msk [vmem:[%s2340_s25 + $0x10] sm:$0xff] %vm1590_vm8, %v1560_v37 }
 0x340   : > { %1591 = vst.msk [vmem:[%s2340_s25] sm:$0xff] %vm1590_vm8, %v1558_v40  ;;  %v1471_v42 = vpop.xlane.xlu1 %1470 }
 0x341   : > { %v1561_v43 = vadd.f32 %v2333_v36, %v1471_v42  ;;  %v1465_v44 = vpop.xlane.xlu0 %1464 }
 0x342   : > { %v1559_v45 = vadd.f32 %v2333_v36, %v1465_v44 }
 0x343   : > { %1594 = vst.msk [vmem:[%s2340_s25 + $0x18] sm:$0xff] %vm1590_vm8, %v1561_v43 }
 0x344   : > { %1592 = vst.msk [vmem:[%s2340_s25 + $0x8] sm:$0xff] %vm1590_vm8, %v1559_v45 }
 0x345   : > { %v1480_v46 = vpop.xlane.xlu0 %1479 }
 0x346   : > { %v1564_v47 = vadd.f32 %v2333_v36, %v1480_v46  ;;  %v1483_v49 = vpop.xlane.xlu1 %1482 }
 0x347   : > { %v1565_v50 = vadd.f32 %v2333_v36, %v1483_v49 }
 0x348   : > { %1597 = vst.msk [vmem:[%s2340_s25 + $0x30] sm:$0xff] %vm1590_vm8, %v1564_v47 }
 0x349   : > { %1598 = vst.msk [vmem:[%s2340_s25 + $0x38] sm:$0xff] %vm1590_vm8, %v1565_v50  ;;  %v1474_v51 = vpop.xlane.xlu0 %1473 }
 0x34a   : > { %v1562_v52 = vadd.f32 %v2333_v36, %v1474_v51  ;;  %v1477_v53 = vpop.xlane.xlu1 %1476 }
 0x34b   : > { %v1563_v55 = vadd.f32 %v2333_v36, %v1477_v53 }
 0x34c   : > { %1595 = vst.msk [vmem:[%s2340_s25 + $0x20] sm:$0xff] %vm1590_vm8, %v1562_v52 }
 0x34d   : > { %1596 = vst.msk [vmem:[%s2340_s25 + $0x28] sm:$0xff] %vm1590_vm8, %v1563_v55  ;;  %v1492_v57 = vpop.xlane.xlu0 %1491 }
 0x34e   : > { %v1568_v59 = vadd.f32 %v2333_v36, %v1492_v57  ;;  %v1495_v60 = vpop.xlane.xlu1 %1494 }
 0x34f   : > { %v1569_v61 = vadd.f32 %v2333_v36, %v1495_v60 }
 0x350   : > { %1601 = vst.msk [vmem:[%s2340_s25 + $0x50] sm:$0xff] %vm1590_vm8, %v1568_v59 }
 0x351   : > { %1602 = vst.msk [vmem:[%s2340_s25 + $0x58] sm:$0xff] %vm1590_vm8, %v1569_v61  ;;  %v1486_v62 = vpop.xlane.xlu0 %1485 }
 0x352   : > { %v1566_v63 = vadd.f32 %v2333_v36, %v1486_v62  ;;  %v1489_v0 = vpop.xlane.xlu1 %1488 }
 0x353   : > { %v1567_v1 = vadd.f32 %v2333_v36, %v1489_v0 }
 0x354   : > { %1599 = vst.msk [vmem:[%s2340_s25 + $0x40] sm:$0xff] %vm1590_vm8, %v1566_v63 }
 0x355   : > { %1600 = vst.msk [vmem:[%s2340_s25 + $0x48] sm:$0xff] %vm1590_vm8, %v1567_v1  ;;  %v1504_v2 = vpop.xlane.xlu0 %1503 }
 0x356   : > { %v1572_v3 = vadd.f32 %v2333_v36, %v1504_v2  ;;  %v1507_v4 = vpop.xlane.xlu1 %1506 }
 0x357   : > { %v1573_v5 = vadd.f32 %v2333_v36, %v1507_v4 }
 0x358   : > { %1605 = vst.msk [vmem:[%s2340_s25 + $0x70] sm:$0xff] %vm1590_vm8, %v1572_v3 }
 0x359   : > { %1606 = vst.msk [vmem:[%s2340_s25 + $0x78] sm:$0xff] %vm1590_vm8, %v1573_v5  ;;  %v1498_v6 = vpop.xlane.xlu0 %1497 }
 0x35a   : > { %v1570_v7 = vadd.f32 %v2333_v36, %v1498_v6  ;;  %v1501_v8 = vpop.xlane.xlu1 %1500 }
 0x35b   : > { %v1571_v9 = vadd.f32 %v2333_v36, %v1501_v8 }
 0x35c   : > { %1603 = vst.msk [vmem:[%s2340_s25 + $0x60] sm:$0xff] %vm1590_vm8, %v1570_v7 }
 0x35d   : > { %1604 = vst.msk [vmem:[%s2340_s25 + $0x68] sm:$0xff] %vm1590_vm8, %v1571_v9  ;;  %v1516_v10 = vpop.xlane.xlu0 %1515 }
 0x35e   : > { %v1576_v11 = vadd.f32 %v2333_v36, %v1516_v10  ;;  %v1519_v12 = vpop.xlane.xlu1 %1518 }
 0x35f   : > { %v1577_v13 = vadd.f32 %v2333_v36, %v1519_v12 }
 0x360   : > { %1609 = vst.msk [vmem:[%s2340_s25 + $0x90] sm:$0xff] %vm1590_vm8, %v1576_v11 }
 0x361   : > { %1610 = vst.msk [vmem:[%s2340_s25 + $0x98] sm:$0xff] %vm1590_vm8, %v1577_v13  ;;  %v1510_v56 = vpop.xlane.xlu0 %1509 }
 0x362   : > { %v1574_v14 = vadd.f32 %v2333_v36, %v1510_v56  ;;  %v1513_v15 = vpop.xlane.xlu1 %1512 }
 0x363   : > { %v1575_v24 = vadd.f32 %v2333_v36, %v1513_v15 }
 0x364   : > { %1607 = vst.msk [vmem:[%s2340_s25 + $0x80] sm:$0xff] %vm1590_vm8, %v1574_v14 }
 0x365   : > { %1608 = vst.msk [vmem:[%s2340_s25 + $0x88] sm:$0xff] %vm1590_vm8, %v1575_v24  ;;  %v1528_v41 = vpop.xlane.xlu0 %1527 }
 0x366   : > { %v1580_v48 = vadd.f32 %v2333_v36, %v1528_v41  ;;  %v1531_v54 = vpop.xlane.xlu1 %1530 }
 0x367   : > { %v1581_v58 = vadd.f32 %v2333_v36, %v1531_v54 }
 0x368   : > { %1613 = vst.msk [vmem:[%s2340_s25 + $0xb0] sm:$0xff] %vm1590_vm8, %v1580_v48 }
 0x369   : > { %1614 = vst.msk [vmem:[%s2340_s25 + $0xb8] sm:$0xff] %vm1590_vm8, %v1581_v58  ;;  %v1522_v16 = vpop.xlane.xlu0 %1521 }
 0x36a   : > { %v1578_v17 = vadd.f32 %v2333_v36, %v1522_v16  ;;  %v1525_v18 = vpop.xlane.xlu1 %1524 }
 0x36b   : > { %v1579_v19 = vadd.f32 %v2333_v36, %v1525_v18 }
 0x36c   : > { %1611 = vst.msk [vmem:[%s2340_s25 + $0xa0] sm:$0xff] %vm1590_vm8, %v1578_v17 }
 0x36d   : > { %1612 = vst.msk [vmem:[%s2340_s25 + $0xa8] sm:$0xff] %vm1590_vm8, %v1579_v19  ;;  %v1540_v20 = vpop.xlane.xlu0 %1539 }
 0x36e   : > { %v1584_v21 = vadd.f32 %v2333_v36, %v1540_v20  ;;  %v1543_v22 = vpop.xlane.xlu1 %1542 }
 0x36f   : > { %v1585_v23 = vadd.f32 %v2333_v36, %v1543_v22 }
 0x370   : > { %1617 = vst.msk [vmem:[%s2340_s25 + $0xd0] sm:$0xff] %vm1590_vm8, %v1584_v21 }
 0x371   : > { %1618 = vst.msk [vmem:[%s2340_s25 + $0xd8] sm:$0xff] %vm1590_vm8, %v1585_v23  ;;  %v1534_v25 = vpop.xlane.xlu0 %1533 }
 0x372   : > { %v1582_v26 = vadd.f32 %v2333_v36, %v1534_v25  ;;  %v1537_v27 = vpop.xlane.xlu1 %1536 }
 0x373   : > { %v1583_v28 = vadd.f32 %v2333_v36, %v1537_v27 }
 0x374   : > { %1615 = vst.msk [vmem:[%s2340_s25 + $0xc0] sm:$0xff] %vm1590_vm8, %v1582_v26 }
 0x375   : > { %1616 = vst.msk [vmem:[%s2340_s25 + $0xc8] sm:$0xff] %vm1590_vm8, %v1583_v28  ;;  %v1546_v30 = vpop.xlane.xlu0 %1545 }
 0x376   : > { %v1586_v29 = vadd.f32 %v2333_v36, %v1546_v30 }
 0x377   : > { %v1549_v31 = vpop.xlane.xlu1 %1548 }
 0x378   : > { %1619 = vst.msk [vmem:[%s2340_s25 + $0xe0] sm:$0xff] %vm1590_vm8, %v1586_v29  ;;  %v1587_v32 = vadd.f32 %v2333_v36, %v1549_v31 }
 0x379   : > { %v1552_v33 = vpop.xlane.xlu0 %1551 }
 0x37a   : > { %1620 = vst.msk [vmem:[%s2340_s25 + $0xe8] sm:$0xff] %vm1590_vm8, %v1587_v32  ;;  %v1588_v34 = vadd.f32 %v2333_v36, %v1552_v33 }
 0x37b   : > { %v1555_v35 = vpop.xlane.xlu1 %1554 }
 0x37c   : > { %1621 = vst.msk [vmem:[%s2340_s25 + $0xf0] sm:$0xff] %vm1590_vm8, %v1588_v34  ;;  %v1589_v39 = vadd.f32 %v2333_v36, %v1555_v35 }
 0x37e   : > { %1622 = vst.msk [vmem:[%s2340_s25 + $0xf8] sm:$0xff] %vm1590_vm8, %v1589_v39 }
 0x37f PF: > { %s20_s11 = sadd.s32 1, %s1944_s11  }
 0x380   : > { %p17_p4 = scmp.ge.s32.totalorder %s20_s11, 4  }
 0x382   :  { %19 = sbr.rel (!%p17_p4) target bundleno = 2 (0x2), region = 86 }

</bundles_post_ra>
